<compile_context>
chip_gen: v6e
topology: v6e:2x2x1
jax: 0.10.0
libtpu: 0.0.40
codegen_flags: <defaults>
</compile_context>

<pallas_src>
from functools import partial

import jax
import jax.numpy as jnp
from jax import lax
from jax.experimental import pallas as pl
from jax.experimental.pallas import tpu as pltpu


def seq2seq_rnn_kernel(
    batch, src_len, trg_len,                      # static (bound via partial)
    tf_ref,                                       # (trg_len,) int32      SMEM
    src_ref, trg_ref,                             # (len*batch, 1) int32  VMEM
    wenc_ref, whh_e_ref, b_e_ref,                 # encoder folded params
    wdec_ref, whh_d_ref, b_d_ref,                 # decoder folded params
    w_out_ref, b_out_ref,                         # output proj (lane-padded)
    out_ref,                                      # (trg_len*batch, v_pad)
    x_scr, xdec_scr, h_scr,                       # VMEM scratch
):
    v_src, hidden = wenc_ref.shape
    v_trg = wdec_ref.shape[0]
    v_pad = w_out_ref.shape[1]

    # ---- hoist loop-invariant weight loads (kept resident, ~6 vregs) ------
    whh_e = whh_e_ref[...]                        # (hid, hid)
    whh_d = whh_d_ref[...]                        # (hid, hid)
    wdec = wdec_ref[...]                          # (v_trg, hid)
    b_d = b_d_ref[...]                            # (1, hid)
    w_out = w_out_ref[...]                        # (hid, v_pad)
    b_out = b_out_ref[...]                        # (1, v_pad), pad cols = -1e30

    # ---- encoder input projections (+ bias) for ALL steps in ONE matmul ---
    onehot_src = (lax.broadcasted_iota(jnp.int32, (src_len * batch, v_src), 1)
                  == src_ref[...]).astype(jnp.float32)
    x_scr[...] = (jnp.dot(onehot_src, wenc_ref[...],
                          preferred_element_type=jnp.float32)
                  + b_e_ref[...])

    # ---- teacher-forced decoder input projections (+ bias): ONE matmul ----
    onehot_trg = (lax.broadcasted_iota(jnp.int32, (trg_len * batch, v_trg), 1)
                  == trg_ref[...]).astype(jnp.float32)
    xdec_scr[...] = (jnp.dot(onehot_trg, wdec,
                             preferred_element_type=jnp.float32) + b_d)

    # ---- encoder recurrence: h = tanh(x_t + h @ W_hh^T) -------------------
    def enc_step(t, h):
        x_t = x_scr[pl.ds(t * batch, batch), :]
        return jnp.tanh(
            x_t + jnp.dot(h, whh_e, preferred_element_type=jnp.float32))

    h = lax.fori_loop(0, src_len, enc_step,
                      jnp.zeros((batch, hidden), jnp.float32), unroll=True)

    # ---- decoder recurrence: per-step chain is one hid x hid matmul -------
    def dec_step(t, carry):
        h_prev, x_in = carry                      # x_in: (batch, hid), bias in
        h = jnp.tanh(
            x_in + jnp.dot(h_prev, whh_d, preferred_element_type=jnp.float32))
        h_scr[pl.ds((t - 1) * batch, batch), :] = h

        def greedy_x():
            # logits + first-maximum argmax + input re-projection; only on
            # non-teacher-forced steps, and skipped on the dead last step.
            pred = (jnp.dot(h, w_out, preferred_element_type=jnp.float32)
                    + b_out)                      # pad cols pinned to -1e30
            mx = jnp.max(pred, axis=1, keepdims=True)
            lio = lax.broadcasted_iota(jnp.int32, (batch, v_pad), 1)
            tok = jnp.min(jnp.where(pred == mx, lio, v_pad),
                          axis=1, keepdims=True).astype(jnp.int32)
            onehot = (lax.broadcasted_iota(jnp.int32, (batch, v_trg), 1)
                      == tok).astype(jnp.float32)
            return (jnp.dot(onehot, wdec, preferred_element_type=jnp.float32)
                    + b_d)

        def teacher_x():
            return xdec_scr[pl.ds(t * batch, batch), :]

        x_next = lax.cond((tf_ref[t] == 0) & (t < trg_len - 1),
                          greedy_x, teacher_x)
        return (h, x_next)

    x0 = xdec_scr[pl.ds(0, batch), :]             # projection of trg[0, :]
    lax.fori_loop(1, trg_len, dec_step, (h, x0), unroll=True)

    # ---- batched output projection + single lane-dense store --------------
    out_ref[pl.ds(0, batch), :] = jnp.zeros((batch, v_pad), jnp.float32)
    logits = (jnp.dot(h_scr[...], w_out, preferred_element_type=jnp.float32)
              + b_out)                            # ((trg_len-1)*batch, v_pad)
    out_ref[pl.ds(batch, (trg_len - 1) * batch), :] = logits


@jax.jit
def seq2seq_forward(src, trg, tf_flags, params):
    """src, trg: (len, batch) int32; tf_flags: (trg_len,) int32 (1 = teacher).
    Returns (trg_len, batch, vocab_trg) f32 logits (row 0 stays zero)."""
    src_len, batch = src.shape
    trg_len = trg.shape[0]
    hidden = params["whh_e"].shape[0]
    v_trg = params["w_out"].shape[0]
    v_pad = ((v_trg + 127) // 128) * 128          # lane-dense output slab

    # ---- fold parameters once, outside the serial kernel ------------------
    wenc = jnp.dot(params["e_enc"], params["wih_e"].T)            # (v_src, hid)
    whh_e_t = params["whh_e"].T                                   # (hid, hid)
    b_e = (params["b_ih_e"] + params["b_hh_e"]).reshape(1, hidden)
    wdec = jnp.dot(params["e_dec"], params["wih_d"].T)            # (v_trg, hid)
    whh_d_t = params["whh_d"].T                                   # (hid, hid)
    b_d = (params["b_ih_d"] + params["b_hh_d"]).reshape(1, hidden)
    # pad W_out^T / b_out to 128 lanes; pad bias = -1e30 so the in-kernel
    # argmax can never select a padded column.
    w_out_t = (jnp.zeros((hidden, v_pad), jnp.float32)
               .at[:, :v_trg].set(params["w_out"].T))
    b_out = (jnp.full((1, v_pad), -1e30, jnp.float32)
             .at[0, :v_trg].set(params["b_out"]))

    src_col = src.reshape(src_len * batch, 1).astype(jnp.int32)
    trg_col = trg.reshape(trg_len * batch, 1).astype(jnp.int32)

    kernel = partial(seq2seq_rnn_kernel, batch, src_len, trg_len)
    vmem = pl.BlockSpec(memory_space=pltpu.MemorySpace.VMEM)
    smem = pl.BlockSpec(memory_space=pltpu.MemorySpace.SMEM)

    # Note: no grid (single TC invocation). For v7x with batch >= 16, add a
    # leading batch grid axis with dimension_semantics=("parallel",) to use
    # the second TensorCore; not worthwhile at batch=2.
    out2d = pl.pallas_call(
        kernel,
        out_shape=jax.ShapeDtypeStruct((trg_len * batch, v_pad), jnp.float32),
        in_specs=[smem] + [vmem] * 10,
        out_specs=vmem,
        scratch_shapes=[
            pltpu.VMEM((src_len * batch, hidden), jnp.float32),        # x_scr
            pltpu.VMEM((trg_len * batch, hidden), jnp.float32),        # xdec
            pltpu.VMEM(((trg_len - 1) * batch, hidden), jnp.float32),  # h_scr
        ],
    )(tf_flags.astype(jnp.int32), src_col, trg_col,
      wenc, whh_e_t, b_e, wdec, whh_d_t, b_d, w_out_t, b_out)

    # slice lane pad, then (trg_len*batch, v_trg) -> (trg_len, batch, v_trg)
    return out2d[:, :v_trg].reshape(trg_len, batch, v_trg)


def make_params(key, v_src, v_trg, emb_dim, hidden_dim):
    """Deterministic synthetic parameters matching the nn.Module shapes."""
    ks = jax.random.split(key, 12)
    bnd = float(1.0 / hidden_dim ** 0.5)
    u = lambda k, shape: jax.random.uniform(k, shape, jnp.float32, -bnd, bnd)
    n = lambda k, shape: jax.random.normal(k, shape, jnp.float32)
    return {
        "e_enc": n(ks[0], (v_src, emb_dim)),
        "wih_e": u(ks[1], (hidden_dim, emb_dim)),
        "whh_e": u(ks[2], (hidden_dim, hidden_dim)),
        "b_ih_e": u(ks[3], (hidden_dim,)),
        "b_hh_e": u(ks[4], (hidden_dim,)),
        "e_dec": n(ks[5], (v_trg, emb_dim)),
        "wih_d": u(ks[6], (hidden_dim, emb_dim)),
        "whh_d": u(ks[7], (hidden_dim, hidden_dim)),
        "b_ih_d": u(ks[8], (hidden_dim,)),
        "b_hh_d": u(ks[9], (hidden_dim,)),
        "w_out": u(ks[10], (v_trg, hidden_dim)),
        "b_out": u(ks[11], (v_trg,)),
    }


if __name__ == "__main__":
    V_SRC, V_TRG = 32, 32          # input_dim / output_dim (vocab sizes)
    EMB, HID = 32, 32              # emb_dim / hidden_dim
    SRC_LEN, TRG_LEN, BATCH = 8, 8, 2

    key = jax.random.PRNGKey(0)
    kp, ksrc, ktrg, ktf = jax.random.split(key, 4)

    params = make_params(kp, V_SRC, V_TRG, EMB, HID)
    src = jax.random.randint(ksrc, (SRC_LEN, BATCH), 0, V_SRC, dtype=jnp.int32)
    trg = jax.random.randint(ktrg, (TRG_LEN, BATCH), 0, V_TRG, dtype=jnp.int32)

    # deterministic per-step replacement for `random.random() < ratio`
    tf = jax.random.bernoulli(ktf, 0.5, (TRG_LEN,)).astype(jnp.int32)

    out = seq2seq_forward(src, trg, tf, params)
    out = jax.block_until_ready(out)

    assert out.shape == (TRG_LEN, BATCH, V_TRG)
    assert bool(jnp.all(jnp.isfinite(out)))
    assert bool(jnp.all(out[0] == 0.0))   # outputs[0] is never written
    print("KERNEL_OK")
</pallas_src>

<mosaic_0001>
module attributes {stable_mosaic.version = 11 : i64} {
  func.func @seq2seq_rnn_kernel(%arg0: memref<8xi32, #tpu.memory_space<smem>>, %arg1: memref<16x1xi32, #tpu.memory_space<vmem>>, %arg2: memref<16x1xi32, #tpu.memory_space<vmem>>, %arg3: memref<32x32xf32, #tpu.memory_space<vmem>>, %arg4: memref<32x32xf32, #tpu.memory_space<vmem>>, %arg5: memref<1x32xf32, #tpu.memory_space<vmem>>, %arg6: memref<32x32xf32, #tpu.memory_space<vmem>>, %arg7: memref<32x32xf32, #tpu.memory_space<vmem>>, %arg8: memref<1x32xf32, #tpu.memory_space<vmem>>, %arg9: memref<32x128xf32, #tpu.memory_space<vmem>>, %arg10: memref<1x128xf32, #tpu.memory_space<vmem>>, %arg11: memref<16x128xf32, #tpu.memory_space<vmem>>, %arg12: memref<16x32xf32, #tpu.memory_space<vmem>>, %arg13: memref<16x32xf32, #tpu.memory_space<vmem>>, %arg14: memref<14x32xf32, #tpu.memory_space<vmem>>) attributes {dimension_semantics = [], scalar_prefetch = 0 : i64, scratch_operands = 3 : i64, tpu.core_type = #tpu.core_type<tc>} {
    %c0 = arith.constant 0 : index
    %c0_0 = arith.constant 0 : index
    %0 = vector.load %arg4[%c0, %c0_0] : memref<32x32xf32, #tpu.memory_space<vmem>>, vector<32x32xf32>
    %c0_1 = arith.constant 0 : index
    %c0_2 = arith.constant 0 : index
    %1 = vector.load %arg7[%c0_1, %c0_2] : memref<32x32xf32, #tpu.memory_space<vmem>>, vector<32x32xf32>
    %c0_3 = arith.constant 0 : index
    %c0_4 = arith.constant 0 : index
    %2 = vector.load %arg6[%c0_3, %c0_4] : memref<32x32xf32, #tpu.memory_space<vmem>>, vector<32x32xf32>
    %c0_5 = arith.constant 0 : index
    %c0_6 = arith.constant 0 : index
    %3 = vector.load %arg8[%c0_5, %c0_6] : memref<1x32xf32, #tpu.memory_space<vmem>>, vector<1x32xf32>
    %c0_7 = arith.constant 0 : index
    %c0_8 = arith.constant 0 : index
    %4 = vector.load %arg9[%c0_7, %c0_8] : memref<32x128xf32, #tpu.memory_space<vmem>>, vector<32x128xf32>
    %c0_9 = arith.constant 0 : index
    %c0_10 = arith.constant 0 : index
    %5 = vector.load %arg10[%c0_9, %c0_10] : memref<1x128xf32, #tpu.memory_space<vmem>>, vector<1x128xf32>
    %6 = tpu.iota {dimensions = array<i32: 1>} : vector<16x32xi32>
    %c0_11 = arith.constant 0 : index
    %c0_12 = arith.constant 0 : index
    %7 = vector.load %arg1[%c0_11, %c0_12] : memref<16x1xi32, #tpu.memory_space<vmem>>, vector<16x1xi32>
    %8 = vector.broadcast %7 : vector<16x1xi32> to vector<16x32xi32>
    %9 = arith.cmpi eq, %6, %8 : vector<16x32xi32>
    %10 = arith.extui %9 : vector<16x32xi1> to vector<16x32xi32>
    %11 = arith.sitofp %10 : vector<16x32xi32> to vector<16x32xf32>
    %c0_13 = arith.constant 0 : index
    %c0_14 = arith.constant 0 : index
    %12 = vector.load %arg3[%c0_13, %c0_14] : memref<32x32xf32, #tpu.memory_space<vmem>>, vector<32x32xf32>
    %cst = arith.constant dense<0.000000e+00> : vector<16x32xf32>
    %13 = tpu.matmul %11, %12, %cst {dimension_numbers = #tpu.dot_dimension_numbers<[1], [0], [0], [1], [0, 0, 1, 1], [], []>} : vector<16x32xf32>, vector<32x32xf32>, vector<16x32xf32> -> vector<16x32xf32>
    %c0_15 = arith.constant 0 : index
    %c0_16 = arith.constant 0 : index
    %14 = vector.load %arg5[%c0_15, %c0_16] : memref<1x32xf32, #tpu.memory_space<vmem>>, vector<1x32xf32>
    %15 = vector.broadcast %14 : vector<1x32xf32> to vector<16x32xf32>
    %16 = arith.addf %13, %15 : vector<16x32xf32>
    %c0_17 = arith.constant 0 : index
    %c0_18 = arith.constant 0 : index
    %17 = vector.load %arg12[%c0_17, %c0_18] : memref<16x32xf32, #tpu.memory_space<vmem>>, vector<16x32xf32>
    tpu.vector_store %arg12[%c0_17, %c0_18], %16 {strides = array<i32>} : memref<16x32xf32, #tpu.memory_space<vmem>>, vector<16x32xf32>,
    %18 = tpu.iota {dimensions = array<i32: 1>} : vector<16x32xi32>
    %c0_19 = arith.constant 0 : index
    %c0_20 = arith.constant 0 : index
    %19 = vector.load %arg2[%c0_19, %c0_20] : memref<16x1xi32, #tpu.memory_space<vmem>>, vector<16x1xi32>
    %20 = vector.broadcast %19 : vector<16x1xi32> to vector<16x32xi32>
    %21 = arith.cmpi eq, %18, %20 : vector<16x32xi32>
    %22 = arith.extui %21 : vector<16x32xi1> to vector<16x32xi32>
    %23 = arith.sitofp %22 : vector<16x32xi32> to vector<16x32xf32>
    %cst_21 = arith.constant dense<0.000000e+00> : vector<16x32xf32>
    %24 = tpu.matmul %23, %2, %cst_21 {dimension_numbers = #tpu.dot_dimension_numbers<[1], [0], [0], [1], [0, 0, 1, 1], [], []>} : vector<16x32xf32>, vector<32x32xf32>, vector<16x32xf32> -> vector<16x32xf32>
    %25 = vector.broadcast %3 : vector<1x32xf32> to vector<16x32xf32>
    %26 = arith.addf %24, %25 : vector<16x32xf32>
    %c0_22 = arith.constant 0 : index
    %c0_23 = arith.constant 0 : index
    %27 = vector.load %arg13[%c0_22, %c0_23] : memref<16x32xf32, #tpu.memory_space<vmem>>, vector<16x32xf32>
    tpu.vector_store %arg13[%c0_22, %c0_23], %26 {strides = array<i32>} : memref<16x32xf32, #tpu.memory_space<vmem>>, vector<16x32xf32>,
    %cst_24 = arith.constant 0.000000e+00 : f32
    %28 = vector.broadcast %cst_24 : f32 to vector<2x32xf32>
    %c0_i32 = arith.constant 0 : i32
    %c2_i32 = arith.constant 2 : i32
    %29 = arith.muli %c0_i32, %c2_i32 : i32
    %30 = arith.index_cast %29 : i32 to index
    %c0_25 = arith.constant 0 : index
    %31 = vector.load %arg12[%30, %c0_25] : memref<16x32xf32, #tpu.memory_space<vmem>>, vector<2x32xf32>
    %cst_26 = arith.constant dense<0.000000e+00> : vector<2x32xf32>
    %32 = tpu.matmul %28, %0, %cst_26 {dimension_numbers = #tpu.dot_dimension_numbers<[1], [0], [0], [1], [0, 0, 1, 1], [], []>} : vector<2x32xf32>, vector<32x32xf32>, vector<2x32xf32> -> vector<2x32xf32>
    %33 = arith.addf %31, %32 : vector<2x32xf32>
    %34 = math.tanh %33 : vector<2x32xf32>
    %c1_i32 = arith.constant 1 : i32
    %c2_i32_27 = arith.constant 2 : i32
    %35 = arith.muli %c1_i32, %c2_i32_27 : i32
    %36 = arith.index_cast %35 : i32 to index
    %c0_28 = arith.constant 0 : index
    %37 = vector.load %arg12[%36, %c0_28] : memref<16x32xf32, #tpu.memory_space<vmem>>, vector<2x32xf32>
    %cst_29 = arith.constant dense<0.000000e+00> : vector<2x32xf32>
    %38 = tpu.matmul %34, %0, %cst_29 {dimension_numbers = #tpu.dot_dimension_numbers<[1], [0], [0], [1], [0, 0, 1, 1], [], []>} : vector<2x32xf32>, vector<32x32xf32>, vector<2x32xf32> -> vector<2x32xf32>
    %39 = arith.addf %37, %38 : vector<2x32xf32>
    %40 = math.tanh %39 : vector<2x32xf32>
    %c2_i32_30 = arith.constant 2 : i32
    %c2_i32_31 = arith.constant 2 : i32
    %41 = arith.muli %c2_i32_30, %c2_i32_31 : i32
    %42 = arith.index_cast %41 : i32 to index
    %c0_32 = arith.constant 0 : index
    %43 = vector.load %arg12[%42, %c0_32] : memref<16x32xf32, #tpu.memory_space<vmem>>, vector<2x32xf32>
    %cst_33 = arith.constant dense<0.000000e+00> : vector<2x32xf32>
    %44 = tpu.matmul %40, %0, %cst_33 {dimension_numbers = #tpu.dot_dimension_numbers<[1], [0], [0], [1], [0, 0, 1, 1], [], []>} : vector<2x32xf32>, vector<32x32xf32>, vector<2x32xf32> -> vector<2x32xf32>
    %45 = arith.addf %43, %44 : vector<2x32xf32>
    %46 = math.tanh %45 : vector<2x32xf32>
    %c3_i32 = arith.constant 3 : i32
    %c2_i32_34 = arith.constant 2 : i32
    %47 = arith.muli %c3_i32, %c2_i32_34 : i32
    %48 = arith.index_cast %47 : i32 to index
    %c0_35 = arith.constant 0 : index
    %49 = vector.load %arg12[%48, %c0_35] : memref<16x32xf32, #tpu.memory_space<vmem>>, vector<2x32xf32>
    %cst_36 = arith.constant dense<0.000000e+00> : vector<2x32xf32>
    %50 = tpu.matmul %46, %0, %cst_36 {dimension_numbers = #tpu.dot_dimension_numbers<[1], [0], [0], [1], [0, 0, 1, 1], [], []>} : vector<2x32xf32>, vector<32x32xf32>, vector<2x32xf32> -> vector<2x32xf32>
    %51 = arith.addf %49, %50 : vector<2x32xf32>
    %52 = math.tanh %51 : vector<2x32xf32>
    %c4_i32 = arith.constant 4 : i32
    %c2_i32_37 = arith.constant 2 : i32
    %53 = arith.muli %c4_i32, %c2_i32_37 : i32
    %54 = arith.index_cast %53 : i32 to index
    %c0_38 = arith.constant 0 : index
    %55 = vector.load %arg12[%54, %c0_38] : memref<16x32xf32, #tpu.memory_space<vmem>>, vector<2x32xf32>
    %cst_39 = arith.constant dense<0.000000e+00> : vector<2x32xf32>
    %56 = tpu.matmul %52, %0, %cst_39 {dimension_numbers = #tpu.dot_dimension_numbers<[1], [0], [0], [1], [0, 0, 1, 1], [], []>} : vector<2x32xf32>, vector<32x32xf32>, vector<2x32xf32> -> vector<2x32xf32>
    %57 = arith.addf %55, %56 : vector<2x32xf32>
    %58 = math.tanh %57 : vector<2x32xf32>
    %c5_i32 = arith.constant 5 : i32
    %c2_i32_40 = arith.constant 2 : i32
    %59 = arith.muli %c5_i32, %c2_i32_40 : i32
    %60 = arith.index_cast %59 : i32 to index
    %c0_41 = arith.constant 0 : index
    %61 = vector.load %arg12[%60, %c0_41] : memref<16x32xf32, #tpu.memory_space<vmem>>, vector<2x32xf32>
    %cst_42 = arith.constant dense<0.000000e+00> : vector<2x32xf32>
    %62 = tpu.matmul %58, %0, %cst_42 {dimension_numbers = #tpu.dot_dimension_numbers<[1], [0], [0], [1], [0, 0, 1, 1], [], []>} : vector<2x32xf32>, vector<32x32xf32>, vector<2x32xf32> -> vector<2x32xf32>
    %63 = arith.addf %61, %62 : vector<2x32xf32>
    %64 = math.tanh %63 : vector<2x32xf32>
    %c6_i32 = arith.constant 6 : i32
    %c2_i32_43 = arith.constant 2 : i32
    %65 = arith.muli %c6_i32, %c2_i32_43 : i32
    %66 = arith.index_cast %65 : i32 to index
    %c0_44 = arith.constant 0 : index
    %67 = vector.load %arg12[%66, %c0_44] : memref<16x32xf32, #tpu.memory_space<vmem>>, vector<2x32xf32>
    %cst_45 = arith.constant dense<0.000000e+00> : vector<2x32xf32>
    %68 = tpu.matmul %64, %0, %cst_45 {dimension_numbers = #tpu.dot_dimension_numbers<[1], [0], [0], [1], [0, 0, 1, 1], [], []>} : vector<2x32xf32>, vector<32x32xf32>, vector<2x32xf32> -> vector<2x32xf32>
    %69 = arith.addf %67, %68 : vector<2x32xf32>
    %70 = math.tanh %69 : vector<2x32xf32>
    %c7_i32 = arith.constant 7 : i32
    %c2_i32_46 = arith.constant 2 : i32
    %71 = arith.muli %c7_i32, %c2_i32_46 : i32
    %72 = arith.index_cast %71 : i32 to index
    %c0_47 = arith.constant 0 : index
    %73 = vector.load %arg12[%72, %c0_47] : memref<16x32xf32, #tpu.memory_space<vmem>>, vector<2x32xf32>
    %cst_48 = arith.constant dense<0.000000e+00> : vector<2x32xf32>
    %74 = tpu.matmul %70, %0, %cst_48 {dimension_numbers = #tpu.dot_dimension_numbers<[1], [0], [0], [1], [0, 0, 1, 1], [], []>} : vector<2x32xf32>, vector<32x32xf32>, vector<2x32xf32> -> vector<2x32xf32>
    %75 = arith.addf %73, %74 : vector<2x32xf32>
    %76 = math.tanh %75 : vector<2x32xf32>
    %c8_i32 = arith.constant 8 : i32
    %c0_49 = arith.constant 0 : index
    %c0_50 = arith.constant 0 : index
    %77 = vector.load %arg13[%c0_49, %c0_50] : memref<16x32xf32, #tpu.memory_space<vmem>>, vector<2x32xf32>
    %c1_i32_51 = arith.constant 1 : i32
    %cst_52 = arith.constant dense<0.000000e+00> : vector<2x32xf32>
    %78 = tpu.matmul %76, %1, %cst_52 {dimension_numbers = #tpu.dot_dimension_numbers<[1], [0], [0], [1], [0, 0, 1, 1], [], []>} : vector<2x32xf32>, vector<32x32xf32>, vector<2x32xf32> -> vector<2x32xf32>
    %79 = arith.addf %77, %78 : vector<2x32xf32>
    %80 = math.tanh %79 : vector<2x32xf32>
    %c1_i32_53 = arith.constant 1 : i32
    %81 = arith.subi %c1_i32_51, %c1_i32_53 : i32
    %c2_i32_54 = arith.constant 2 : i32
    %82 = arith.muli %81, %c2_i32_54 : i32
    %83 = arith.index_cast %82 : i32 to index
    %c0_55 = arith.constant 0 : index
    %84 = vector.load %arg14[%83, %c0_55] : memref<14x32xf32, #tpu.memory_space<vmem>>, vector<2x32xf32>
    tpu.vector_store %arg14[%83, %c0_55], %80 {strides = array<i32>} : memref<14x32xf32, #tpu.memory_space<vmem>>, vector<2x32xf32>,
    %85 = arith.index_cast %c1_i32_51 : i32 to index
    %86 = memref.load %arg0[%85] : memref<8xi32, #tpu.memory_space<smem>>
    %c0_i32_56 = arith.constant 0 : i32
    %87 = arith.cmpi eq, %86, %c0_i32_56 : i32
    %c7_i32_57 = arith.constant 7 : i32
    %88 = arith.cmpi slt, %c1_i32_51, %c7_i32_57 : i32
    %89 = arith.andi %87, %88 : i1
    %90 = arith.extui %89 : i1 to i32
    %c0_i32_58 = arith.constant 0 : i32
    %91 = arith.cmpi ne, %90, %c0_i32_58 : i32
    %92 = scf.if %91 -> (vector<2x32xf32>) {
      %cst_115 = arith.constant dense<0.000000e+00> : vector<2x128xf32>
      %190 = tpu.matmul %80, %4, %cst_115 {dimension_numbers = #tpu.dot_dimension_numbers<[1], [0], [0], [1], [0, 0, 1, 1], [], []>} : vector<2x32xf32>, vector<32x128xf32>, vector<2x128xf32> -> vector<2x128xf32>
      %191 = vector.broadcast %5 : vector<1x128xf32> to vector<2x128xf32>
      %192 = arith.addf %190, %191 : vector<2x128xf32>
      %cst_116 = arith.constant dense<0xFF800000> : vector<2xf32>
      %193 = vector.multi_reduction <maximumf>, %192, %cst_116 [1] : vector<2x128xf32> to vector<2xf32>
      %194 = vector.shape_cast %193 : vector<2xf32> to vector<2x1xf32>
      %195 = tpu.iota {dimensions = array<i32: 1>} : vector<2x128xi32>
      %196 = vector.broadcast %194 : vector<2x1xf32> to vector<2x128xf32>
      %197 = arith.cmpf oeq, %192, %196 : vector<2x128xf32>
      %c128_i32 = arith.constant 128 : i32
      %198 = vector.broadcast %c128_i32 : i32 to vector<2x128xi32>
      %199 = arith.select %197, %195, %198 : vector<2x128xi1>, vector<2x128xi32>
      %cst_117 = arith.constant dense<2147483647> : vector<2xi32>
      %200 = vector.multi_reduction <minsi>, %199, %cst_117 [1] : vector<2x128xi32> to vector<2xi32>
      %201 = vector.shape_cast %200 : vector<2xi32> to vector<2x1xi32>
      %202 = tpu.iota {dimensions = array<i32: 1>} : vector<2x32xi32>
      %203 = vector.broadcast %201 : vector<2x1xi32> to vector<2x32xi32>
      %204 = arith.cmpi eq, %202, %203 : vector<2x32xi32>
      %205 = arith.extui %204 : vector<2x32xi1> to vector<2x32xi32>
      %206 = arith.sitofp %205 : vector<2x32xi32> to vector<2x32xf32>
      %cst_118 = arith.constant dense<0.000000e+00> : vector<2x32xf32>
      %207 = tpu.matmul %206, %2, %cst_118 {dimension_numbers = #tpu.dot_dimension_numbers<[1], [0], [0], [1], [0, 0, 1, 1], [], []>} : vector<2x32xf32>, vector<32x32xf32>, vector<2x32xf32> -> vector<2x32xf32>
      %208 = vector.broadcast %3 : vector<1x32xf32> to vector<2x32xf32>
      %209 = arith.addf %207, %208 : vector<2x32xf32>
      scf.yield %209 : vector<2x32xf32>
    } else {
      %c2_i32_115 = arith.constant 2 : i32
      %190 = arith.muli %c1_i32_51, %c2_i32_115 : i32
      %191 = arith.index_cast %190 : i32 to index
      %c0_116 = arith.constant 0 : index
      %192 = vector.load %arg13[%191, %c0_116] : memref<16x32xf32, #tpu.memory_space<vmem>>, vector<2x32xf32>
      scf.yield %192 : vector<2x32xf32>
    }
    %c2_i32_59 = arith.constant 2 : i32
    %cst_60 = arith.constant dense<0.000000e+00> : vector<2x32xf32>
    %93 = tpu.matmul %80, %1, %cst_60 {dimension_numbers = #tpu.dot_dimension_numbers<[1], [0], [0], [1], [0, 0, 1, 1], [], []>} : vector<2x32xf32>, vector<32x32xf32>, vector<2x32xf32> -> vector<2x32xf32>
    %94 = arith.addf %92, %93 : vector<2x32xf32>
    %95 = math.tanh %94 : vector<2x32xf32>
    %c1_i32_61 = arith.constant 1 : i32
    %96 = arith.subi %c2_i32_59, %c1_i32_61 : i32
    %c2_i32_62 = arith.constant 2 : i32
    %97 = arith.muli %96, %c2_i32_62 : i32
    %98 = arith.index_cast %97 : i32 to index
    %c0_63 = arith.constant 0 : index
    %99 = vector.load %arg14[%98, %c0_63] : memref<14x32xf32, #tpu.memory_space<vmem>>, vector<2x32xf32>
    tpu.vector_store %arg14[%98, %c0_63], %95 {strides = array<i32>} : memref<14x32xf32, #tpu.memory_space<vmem>>, vector<2x32xf32>,
    %100 = arith.index_cast %c2_i32_59 : i32 to index
    %101 = memref.load %arg0[%100] : memref<8xi32, #tpu.memory_space<smem>>
    %c0_i32_64 = arith.constant 0 : i32
    %102 = arith.cmpi eq, %101, %c0_i32_64 : i32
    %c7_i32_65 = arith.constant 7 : i32
    %103 = arith.cmpi slt, %c2_i32_59, %c7_i32_65 : i32
    %104 = arith.andi %102, %103 : i1
    %105 = arith.extui %104 : i1 to i32
    %c0_i32_66 = arith.constant 0 : i32
    %106 = arith.cmpi ne, %105, %c0_i32_66 : i32
    %107 = scf.if %106 -> (vector<2x32xf32>) {
      %cst_115 = arith.constant dense<0.000000e+00> : vector<2x128xf32>
      %190 = tpu.matmul %95, %4, %cst_115 {dimension_numbers = #tpu.dot_dimension_numbers<[1], [0], [0], [1], [0, 0, 1, 1], [], []>} : vector<2x32xf32>, vector<32x128xf32>, vector<2x128xf32> -> vector<2x128xf32>
      %191 = vector.broadcast %5 : vector<1x128xf32> to vector<2x128xf32>
      %192 = arith.addf %190, %191 : vector<2x128xf32>
      %cst_116 = arith.constant dense<0xFF800000> : vector<2xf32>
      %193 = vector.multi_reduction <maximumf>, %192, %cst_116 [1] : vector<2x128xf32> to vector<2xf32>
      %194 = vector.shape_cast %193 : vector<2xf32> to vector<2x1xf32>
      %195 = tpu.iota {dimensions = array<i32: 1>} : vector<2x128xi32>
      %196 = vector.broadcast %194 : vector<2x1xf32> to vector<2x128xf32>
      %197 = arith.cmpf oeq, %192, %196 : vector<2x128xf32>
      %c128_i32 = arith.constant 128 : i32
      %198 = vector.broadcast %c128_i32 : i32 to vector<2x128xi32>
      %199 = arith.select %197, %195, %198 : vector<2x128xi1>, vector<2x128xi32>
      %cst_117 = arith.constant dense<2147483647> : vector<2xi32>
      %200 = vector.multi_reduction <minsi>, %199, %cst_117 [1] : vector<2x128xi32> to vector<2xi32>
      %201 = vector.shape_cast %200 : vector<2xi32> to vector<2x1xi32>
      %202 = tpu.iota {dimensions = array<i32: 1>} : vector<2x32xi32>
      %203 = vector.broadcast %201 : vector<2x1xi32> to vector<2x32xi32>
      %204 = arith.cmpi eq, %202, %203 : vector<2x32xi32>
      %205 = arith.extui %204 : vector<2x32xi1> to vector<2x32xi32>
      %206 = arith.sitofp %205 : vector<2x32xi32> to vector<2x32xf32>
      %cst_118 = arith.constant dense<0.000000e+00> : vector<2x32xf32>
      %207 = tpu.matmul %206, %2, %cst_118 {dimension_numbers = #tpu.dot_dimension_numbers<[1], [0], [0], [1], [0, 0, 1, 1], [], []>} : vector<2x32xf32>, vector<32x32xf32>, vector<2x32xf32> -> vector<2x32xf32>
      %208 = vector.broadcast %3 : vector<1x32xf32> to vector<2x32xf32>
      %209 = arith.addf %207, %208 : vector<2x32xf32>
      scf.yield %209 : vector<2x32xf32>
    } else {
      %c2_i32_115 = arith.constant 2 : i32
      %190 = arith.muli %c2_i32_59, %c2_i32_115 : i32
      %191 = arith.index_cast %190 : i32 to index
      %c0_116 = arith.constant 0 : index
      %192 = vector.load %arg13[%191, %c0_116] : memref<16x32xf32, #tpu.memory_space<vmem>>, vector<2x32xf32>
      scf.yield %192 : vector<2x32xf32>
    }
    %c3_i32_67 = arith.constant 3 : i32
    %cst_68 = arith.constant dense<0.000000e+00> : vector<2x32xf32>
    %108 = tpu.matmul %95, %1, %cst_68 {dimension_numbers = #tpu.dot_dimension_numbers<[1], [0], [0], [1], [0, 0, 1, 1], [], []>} : vector<2x32xf32>, vector<32x32xf32>, vector<2x32xf32> -> vector<2x32xf32>
    %109 = arith.addf %107, %108 : vector<2x32xf32>
    %110 = math.tanh %109 : vector<2x32xf32>
    %c1_i32_69 = arith.constant 1 : i32
    %111 = arith.subi %c3_i32_67, %c1_i32_69 : i32
    %c2_i32_70 = arith.constant 2 : i32
    %112 = arith.muli %111, %c2_i32_70 : i32
    %113 = arith.index_cast %112 : i32 to index
    %c0_71 = arith.constant 0 : index
    %114 = vector.load %arg14[%113, %c0_71] : memref<14x32xf32, #tpu.memory_space<vmem>>, vector<2x32xf32>
    tpu.vector_store %arg14[%113, %c0_71], %110 {strides = array<i32>} : memref<14x32xf32, #tpu.memory_space<vmem>>, vector<2x32xf32>,
    %115 = arith.index_cast %c3_i32_67 : i32 to index
    %116 = memref.load %arg0[%115] : memref<8xi32, #tpu.memory_space<smem>>
    %c0_i32_72 = arith.constant 0 : i32
    %117 = arith.cmpi eq, %116, %c0_i32_72 : i32
    %c7_i32_73 = arith.constant 7 : i32
    %118 = arith.cmpi slt, %c3_i32_67, %c7_i32_73 : i32
    %119 = arith.andi %117, %118 : i1
    %120 = arith.extui %119 : i1 to i32
    %c0_i32_74 = arith.constant 0 : i32
    %121 = arith.cmpi ne, %120, %c0_i32_74 : i32
    %122 = scf.if %121 -> (vector<2x32xf32>) {
      %cst_115 = arith.constant dense<0.000000e+00> : vector<2x128xf32>
      %190 = tpu.matmul %110, %4, %cst_115 {dimension_numbers = #tpu.dot_dimension_numbers<[1], [0], [0], [1], [0, 0, 1, 1], [], []>} : vector<2x32xf32>, vector<32x128xf32>, vector<2x128xf32> -> vector<2x128xf32>
      %191 = vector.broadcast %5 : vector<1x128xf32> to vector<2x128xf32>
      %192 = arith.addf %190, %191 : vector<2x128xf32>
      %cst_116 = arith.constant dense<0xFF800000> : vector<2xf32>
      %193 = vector.multi_reduction <maximumf>, %192, %cst_116 [1] : vector<2x128xf32> to vector<2xf32>
      %194 = vector.shape_cast %193 : vector<2xf32> to vector<2x1xf32>
      %195 = tpu.iota {dimensions = array<i32: 1>} : vector<2x128xi32>
      %196 = vector.broadcast %194 : vector<2x1xf32> to vector<2x128xf32>
      %197 = arith.cmpf oeq, %192, %196 : vector<2x128xf32>
      %c128_i32 = arith.constant 128 : i32
      %198 = vector.broadcast %c128_i32 : i32 to vector<2x128xi32>
      %199 = arith.select %197, %195, %198 : vector<2x128xi1>, vector<2x128xi32>
      %cst_117 = arith.constant dense<2147483647> : vector<2xi32>
      %200 = vector.multi_reduction <minsi>, %199, %cst_117 [1] : vector<2x128xi32> to vector<2xi32>
      %201 = vector.shape_cast %200 : vector<2xi32> to vector<2x1xi32>
      %202 = tpu.iota {dimensions = array<i32: 1>} : vector<2x32xi32>
      %203 = vector.broadcast %201 : vector<2x1xi32> to vector<2x32xi32>
      %204 = arith.cmpi eq, %202, %203 : vector<2x32xi32>
      %205 = arith.extui %204 : vector<2x32xi1> to vector<2x32xi32>
      %206 = arith.sitofp %205 : vector<2x32xi32> to vector<2x32xf32>
      %cst_118 = arith.constant dense<0.000000e+00> : vector<2x32xf32>
      %207 = tpu.matmul %206, %2, %cst_118 {dimension_numbers = #tpu.dot_dimension_numbers<[1], [0], [0], [1], [0, 0, 1, 1], [], []>} : vector<2x32xf32>, vector<32x32xf32>, vector<2x32xf32> -> vector<2x32xf32>
      %208 = vector.broadcast %3 : vector<1x32xf32> to vector<2x32xf32>
      %209 = arith.addf %207, %208 : vector<2x32xf32>
      scf.yield %209 : vector<2x32xf32>
    } else {
      %c2_i32_115 = arith.constant 2 : i32
      %190 = arith.muli %c3_i32_67, %c2_i32_115 : i32
      %191 = arith.index_cast %190 : i32 to index
      %c0_116 = arith.constant 0 : index
      %192 = vector.load %arg13[%191, %c0_116] : memref<16x32xf32, #tpu.memory_space<vmem>>, vector<2x32xf32>
      scf.yield %192 : vector<2x32xf32>
    }
    %c4_i32_75 = arith.constant 4 : i32
    %cst_76 = arith.constant dense<0.000000e+00> : vector<2x32xf32>
    %123 = tpu.matmul %110, %1, %cst_76 {dimension_numbers = #tpu.dot_dimension_numbers<[1], [0], [0], [1], [0, 0, 1, 1], [], []>} : vector<2x32xf32>, vector<32x32xf32>, vector<2x32xf32> -> vector<2x32xf32>
    %124 = arith.addf %122, %123 : vector<2x32xf32>
    %125 = math.tanh %124 : vector<2x32xf32>
    %c1_i32_77 = arith.constant 1 : i32
    %126 = arith.subi %c4_i32_75, %c1_i32_77 : i32
    %c2_i32_78 = arith.constant 2 : i32
    %127 = arith.muli %126, %c2_i32_78 : i32
    %128 = arith.index_cast %127 : i32 to index
    %c0_79 = arith.constant 0 : index
    %129 = vector.load %arg14[%128, %c0_79] : memref<14x32xf32, #tpu.memory_space<vmem>>, vector<2x32xf32>
    tpu.vector_store %arg14[%128, %c0_79], %125 {strides = array<i32>} : memref<14x32xf32, #tpu.memory_space<vmem>>, vector<2x32xf32>,
    %130 = arith.index_cast %c4_i32_75 : i32 to index
    %131 = memref.load %arg0[%130] : memref<8xi32, #tpu.memory_space<smem>>
    %c0_i32_80 = arith.constant 0 : i32
    %132 = arith.cmpi eq, %131, %c0_i32_80 : i32
    %c7_i32_81 = arith.constant 7 : i32
    %133 = arith.cmpi slt, %c4_i32_75, %c7_i32_81 : i32
    %134 = arith.andi %132, %133 : i1
    %135 = arith.extui %134 : i1 to i32
    %c0_i32_82 = arith.constant 0 : i32
    %136 = arith.cmpi ne, %135, %c0_i32_82 : i32
    %137 = scf.if %136 -> (vector<2x32xf32>) {
      %cst_115 = arith.constant dense<0.000000e+00> : vector<2x128xf32>
      %190 = tpu.matmul %125, %4, %cst_115 {dimension_numbers = #tpu.dot_dimension_numbers<[1], [0], [0], [1], [0, 0, 1, 1], [], []>} : vector<2x32xf32>, vector<32x128xf32>, vector<2x128xf32> -> vector<2x128xf32>
      %191 = vector.broadcast %5 : vector<1x128xf32> to vector<2x128xf32>
      %192 = arith.addf %190, %191 : vector<2x128xf32>
      %cst_116 = arith.constant dense<0xFF800000> : vector<2xf32>
      %193 = vector.multi_reduction <maximumf>, %192, %cst_116 [1] : vector<2x128xf32> to vector<2xf32>
      %194 = vector.shape_cast %193 : vector<2xf32> to vector<2x1xf32>
      %195 = tpu.iota {dimensions = array<i32: 1>} : vector<2x128xi32>
      %196 = vector.broadcast %194 : vector<2x1xf32> to vector<2x128xf32>
      %197 = arith.cmpf oeq, %192, %196 : vector<2x128xf32>
      %c128_i32 = arith.constant 128 : i32
      %198 = vector.broadcast %c128_i32 : i32 to vector<2x128xi32>
      %199 = arith.select %197, %195, %198 : vector<2x128xi1>, vector<2x128xi32>
      %cst_117 = arith.constant dense<2147483647> : vector<2xi32>
      %200 = vector.multi_reduction <minsi>, %199, %cst_117 [1] : vector<2x128xi32> to vector<2xi32>
      %201 = vector.shape_cast %200 : vector<2xi32> to vector<2x1xi32>
      %202 = tpu.iota {dimensions = array<i32: 1>} : vector<2x32xi32>
      %203 = vector.broadcast %201 : vector<2x1xi32> to vector<2x32xi32>
      %204 = arith.cmpi eq, %202, %203 : vector<2x32xi32>
      %205 = arith.extui %204 : vector<2x32xi1> to vector<2x32xi32>
      %206 = arith.sitofp %205 : vector<2x32xi32> to vector<2x32xf32>
      %cst_118 = arith.constant dense<0.000000e+00> : vector<2x32xf32>
      %207 = tpu.matmul %206, %2, %cst_118 {dimension_numbers = #tpu.dot_dimension_numbers<[1], [0], [0], [1], [0, 0, 1, 1], [], []>} : vector<2x32xf32>, vector<32x32xf32>, vector<2x32xf32> -> vector<2x32xf32>
      %208 = vector.broadcast %3 : vector<1x32xf32> to vector<2x32xf32>
      %209 = arith.addf %207, %208 : vector<2x32xf32>
      scf.yield %209 : vector<2x32xf32>
    } else {
      %c2_i32_115 = arith.constant 2 : i32
      %190 = arith.muli %c4_i32_75, %c2_i32_115 : i32
      %191 = arith.index_cast %190 : i32 to index
      %c0_116 = arith.constant 0 : index
      %192 = vector.load %arg13[%191, %c0_116] : memref<16x32xf32, #tpu.memory_space<vmem>>, vector<2x32xf32>
      scf.yield %192 : vector<2x32xf32>
    }
    %c5_i32_83 = arith.constant 5 : i32
    %cst_84 = arith.constant dense<0.000000e+00> : vector<2x32xf32>
    %138 = tpu.matmul %125, %1, %cst_84 {dimension_numbers = #tpu.dot_dimension_numbers<[1], [0], [0], [1], [0, 0, 1, 1], [], []>} : vector<2x32xf32>, vector<32x32xf32>, vector<2x32xf32> -> vector<2x32xf32>
    %139 = arith.addf %137, %138 : vector<2x32xf32>
    %140 = math.tanh %139 : vector<2x32xf32>
    %c1_i32_85 = arith.constant 1 : i32
    %141 = arith.subi %c5_i32_83, %c1_i32_85 : i32
    %c2_i32_86 = arith.constant 2 : i32
    %142 = arith.muli %141, %c2_i32_86 : i32
    %143 = arith.index_cast %142 : i32 to index
    %c0_87 = arith.constant 0 : index
    %144 = vector.load %arg14[%143, %c0_87] : memref<14x32xf32, #tpu.memory_space<vmem>>, vector<2x32xf32>
    tpu.vector_store %arg14[%143, %c0_87], %140 {strides = array<i32>} : memref<14x32xf32, #tpu.memory_space<vmem>>, vector<2x32xf32>,
    %145 = arith.index_cast %c5_i32_83 : i32 to index
    %146 = memref.load %arg0[%145] : memref<8xi32, #tpu.memory_space<smem>>
    %c0_i32_88 = arith.constant 0 : i32
    %147 = arith.cmpi eq, %146, %c0_i32_88 : i32
    %c7_i32_89 = arith.constant 7 : i32
    %148 = arith.cmpi slt, %c5_i32_83, %c7_i32_89 : i32
    %149 = arith.andi %147, %148 : i1
    %150 = arith.extui %149 : i1 to i32
    %c0_i32_90 = arith.constant 0 : i32
    %151 = arith.cmpi ne, %150, %c0_i32_90 : i32
    %152 = scf.if %151 -> (vector<2x32xf32>) {
      %cst_115 = arith.constant dense<0.000000e+00> : vector<2x128xf32>
      %190 = tpu.matmul %140, %4, %cst_115 {dimension_numbers = #tpu.dot_dimension_numbers<[1], [0], [0], [1], [0, 0, 1, 1], [], []>} : vector<2x32xf32>, vector<32x128xf32>, vector<2x128xf32> -> vector<2x128xf32>
      %191 = vector.broadcast %5 : vector<1x128xf32> to vector<2x128xf32>
      %192 = arith.addf %190, %191 : vector<2x128xf32>
      %cst_116 = arith.constant dense<0xFF800000> : vector<2xf32>
      %193 = vector.multi_reduction <maximumf>, %192, %cst_116 [1] : vector<2x128xf32> to vector<2xf32>
      %194 = vector.shape_cast %193 : vector<2xf32> to vector<2x1xf32>
      %195 = tpu.iota {dimensions = array<i32: 1>} : vector<2x128xi32>
      %196 = vector.broadcast %194 : vector<2x1xf32> to vector<2x128xf32>
      %197 = arith.cmpf oeq, %192, %196 : vector<2x128xf32>
      %c128_i32 = arith.constant 128 : i32
      %198 = vector.broadcast %c128_i32 : i32 to vector<2x128xi32>
      %199 = arith.select %197, %195, %198 : vector<2x128xi1>, vector<2x128xi32>
      %cst_117 = arith.constant dense<2147483647> : vector<2xi32>
      %200 = vector.multi_reduction <minsi>, %199, %cst_117 [1] : vector<2x128xi32> to vector<2xi32>
      %201 = vector.shape_cast %200 : vector<2xi32> to vector<2x1xi32>
      %202 = tpu.iota {dimensions = array<i32: 1>} : vector<2x32xi32>
      %203 = vector.broadcast %201 : vector<2x1xi32> to vector<2x32xi32>
      %204 = arith.cmpi eq, %202, %203 : vector<2x32xi32>
      %205 = arith.extui %204 : vector<2x32xi1> to vector<2x32xi32>
      %206 = arith.sitofp %205 : vector<2x32xi32> to vector<2x32xf32>
      %cst_118 = arith.constant dense<0.000000e+00> : vector<2x32xf32>
      %207 = tpu.matmul %206, %2, %cst_118 {dimension_numbers = #tpu.dot_dimension_numbers<[1], [0], [0], [1], [0, 0, 1, 1], [], []>} : vector<2x32xf32>, vector<32x32xf32>, vector<2x32xf32> -> vector<2x32xf32>
      %208 = vector.broadcast %3 : vector<1x32xf32> to vector<2x32xf32>
      %209 = arith.addf %207, %208 : vector<2x32xf32>
      scf.yield %209 : vector<2x32xf32>
    } else {
      %c2_i32_115 = arith.constant 2 : i32
      %190 = arith.muli %c5_i32_83, %c2_i32_115 : i32
      %191 = arith.index_cast %190 : i32 to index
      %c0_116 = arith.constant 0 : index
      %192 = vector.load %arg13[%191, %c0_116] : memref<16x32xf32, #tpu.memory_space<vmem>>, vector<2x32xf32>
      scf.yield %192 : vector<2x32xf32>
    }
    %c6_i32_91 = arith.constant 6 : i32
    %cst_92 = arith.constant dense<0.000000e+00> : vector<2x32xf32>
    %153 = tpu.matmul %140, %1, %cst_92 {dimension_numbers = #tpu.dot_dimension_numbers<[1], [0], [0], [1], [0, 0, 1, 1], [], []>} : vector<2x32xf32>, vector<32x32xf32>, vector<2x32xf32> -> vector<2x32xf32>
    %154 = arith.addf %152, %153 : vector<2x32xf32>
    %155 = math.tanh %154 : vector<2x32xf32>
    %c1_i32_93 = arith.constant 1 : i32
    %156 = arith.subi %c6_i32_91, %c1_i32_93 : i32
    %c2_i32_94 = arith.constant 2 : i32
    %157 = arith.muli %156, %c2_i32_94 : i32
    %158 = arith.index_cast %157 : i32 to index
    %c0_95 = arith.constant 0 : index
    %159 = vector.load %arg14[%158, %c0_95] : memref<14x32xf32, #tpu.memory_space<vmem>>, vector<2x32xf32>
    tpu.vector_store %arg14[%158, %c0_95], %155 {strides = array<i32>} : memref<14x32xf32, #tpu.memory_space<vmem>>, vector<2x32xf32>,
    %160 = arith.index_cast %c6_i32_91 : i32 to index
    %161 = memref.load %arg0[%160] : memref<8xi32, #tpu.memory_space<smem>>
    %c0_i32_96 = arith.constant 0 : i32
    %162 = arith.cmpi eq, %161, %c0_i32_96 : i32
    %c7_i32_97 = arith.constant 7 : i32
    %163 = arith.cmpi slt, %c6_i32_91, %c7_i32_97 : i32
    %164 = arith.andi %162, %163 : i1
    %165 = arith.extui %164 : i1 to i32
    %c0_i32_98 = arith.constant 0 : i32
    %166 = arith.cmpi ne, %165, %c0_i32_98 : i32
    %167 = scf.if %166 -> (vector<2x32xf32>) {
      %cst_115 = arith.constant dense<0.000000e+00> : vector<2x128xf32>
      %190 = tpu.matmul %155, %4, %cst_115 {dimension_numbers = #tpu.dot_dimension_numbers<[1], [0], [0], [1], [0, 0, 1, 1], [], []>} : vector<2x32xf32>, vector<32x128xf32>, vector<2x128xf32> -> vector<2x128xf32>
      %191 = vector.broadcast %5 : vector<1x128xf32> to vector<2x128xf32>
      %192 = arith.addf %190, %191 : vector<2x128xf32>
      %cst_116 = arith.constant dense<0xFF800000> : vector<2xf32>
      %193 = vector.multi_reduction <maximumf>, %192, %cst_116 [1] : vector<2x128xf32> to vector<2xf32>
      %194 = vector.shape_cast %193 : vector<2xf32> to vector<2x1xf32>
      %195 = tpu.iota {dimensions = array<i32: 1>} : vector<2x128xi32>
      %196 = vector.broadcast %194 : vector<2x1xf32> to vector<2x128xf32>
      %197 = arith.cmpf oeq, %192, %196 : vector<2x128xf32>
      %c128_i32 = arith.constant 128 : i32
      %198 = vector.broadcast %c128_i32 : i32 to vector<2x128xi32>
      %199 = arith.select %197, %195, %198 : vector<2x128xi1>, vector<2x128xi32>
      %cst_117 = arith.constant dense<2147483647> : vector<2xi32>
      %200 = vector.multi_reduction <minsi>, %199, %cst_117 [1] : vector<2x128xi32> to vector<2xi32>
      %201 = vector.shape_cast %200 : vector<2xi32> to vector<2x1xi32>
      %202 = tpu.iota {dimensions = array<i32: 1>} : vector<2x32xi32>
      %203 = vector.broadcast %201 : vector<2x1xi32> to vector<2x32xi32>
      %204 = arith.cmpi eq, %202, %203 : vector<2x32xi32>
      %205 = arith.extui %204 : vector<2x32xi1> to vector<2x32xi32>
      %206 = arith.sitofp %205 : vector<2x32xi32> to vector<2x32xf32>
      %cst_118 = arith.constant dense<0.000000e+00> : vector<2x32xf32>
      %207 = tpu.matmul %206, %2, %cst_118 {dimension_numbers = #tpu.dot_dimension_numbers<[1], [0], [0], [1], [0, 0, 1, 1], [], []>} : vector<2x32xf32>, vector<32x32xf32>, vector<2x32xf32> -> vector<2x32xf32>
      %208 = vector.broadcast %3 : vector<1x32xf32> to vector<2x32xf32>
      %209 = arith.addf %207, %208 : vector<2x32xf32>
      scf.yield %209 : vector<2x32xf32>
    } else {
      %c2_i32_115 = arith.constant 2 : i32
      %190 = arith.muli %c6_i32_91, %c2_i32_115 : i32
      %191 = arith.index_cast %190 : i32 to index
      %c0_116 = arith.constant 0 : index
      %192 = vector.load %arg13[%191, %c0_116] : memref<16x32xf32, #tpu.memory_space<vmem>>, vector<2x32xf32>
      scf.yield %192 : vector<2x32xf32>
    }
    %c7_i32_99 = arith.constant 7 : i32
    %cst_100 = arith.constant dense<0.000000e+00> : vector<2x32xf32>
    %168 = tpu.matmul %155, %1, %cst_100 {dimension_numbers = #tpu.dot_dimension_numbers<[1], [0], [0], [1], [0, 0, 1, 1], [], []>} : vector<2x32xf32>, vector<32x32xf32>, vector<2x32xf32> -> vector<2x32xf32>
    %169 = arith.addf %167, %168 : vector<2x32xf32>
    %170 = math.tanh %169 : vector<2x32xf32>
    %c1_i32_101 = arith.constant 1 : i32
    %171 = arith.subi %c7_i32_99, %c1_i32_101 : i32
    %c2_i32_102 = arith.constant 2 : i32
    %172 = arith.muli %171, %c2_i32_102 : i32
    %173 = arith.index_cast %172 : i32 to index
    %c0_103 = arith.constant 0 : index
    %174 = vector.load %arg14[%173, %c0_103] : memref<14x32xf32, #tpu.memory_space<vmem>>, vector<2x32xf32>
    tpu.vector_store %arg14[%173, %c0_103], %170 {strides = array<i32>} : memref<14x32xf32, #tpu.memory_space<vmem>>, vector<2x32xf32>,
    %175 = arith.index_cast %c7_i32_99 : i32 to index
    %176 = memref.load %arg0[%175] : memref<8xi32, #tpu.memory_space<smem>>
    %c0_i32_104 = arith.constant 0 : i32
    %177 = arith.cmpi eq, %176, %c0_i32_104 : i32
    %c7_i32_105 = arith.constant 7 : i32
    %178 = arith.cmpi slt, %c7_i32_99, %c7_i32_105 : i32
    %179 = arith.andi %177, %178 : i1
    %180 = arith.extui %179 : i1 to i32
    %c0_i32_106 = arith.constant 0 : i32
    %181 = arith.cmpi ne, %180, %c0_i32_106 : i32
    %182 = scf.if %181 -> (vector<2x32xf32>) {
      %cst_115 = arith.constant dense<0.000000e+00> : vector<2x128xf32>
      %190 = tpu.matmul %170, %4, %cst_115 {dimension_numbers = #tpu.dot_dimension_numbers<[1], [0], [0], [1], [0, 0, 1, 1], [], []>} : vector<2x32xf32>, vector<32x128xf32>, vector<2x128xf32> -> vector<2x128xf32>
      %191 = vector.broadcast %5 : vector<1x128xf32> to vector<2x128xf32>
      %192 = arith.addf %190, %191 : vector<2x128xf32>
      %cst_116 = arith.constant dense<0xFF800000> : vector<2xf32>
      %193 = vector.multi_reduction <maximumf>, %192, %cst_116 [1] : vector<2x128xf32> to vector<2xf32>
      %194 = vector.shape_cast %193 : vector<2xf32> to vector<2x1xf32>
      %195 = tpu.iota {dimensions = array<i32: 1>} : vector<2x128xi32>
      %196 = vector.broadcast %194 : vector<2x1xf32> to vector<2x128xf32>
      %197 = arith.cmpf oeq, %192, %196 : vector<2x128xf32>
      %c128_i32 = arith.constant 128 : i32
      %198 = vector.broadcast %c128_i32 : i32 to vector<2x128xi32>
      %199 = arith.select %197, %195, %198 : vector<2x128xi1>, vector<2x128xi32>
      %cst_117 = arith.constant dense<2147483647> : vector<2xi32>
      %200 = vector.multi_reduction <minsi>, %199, %cst_117 [1] : vector<2x128xi32> to vector<2xi32>
      %201 = vector.shape_cast %200 : vector<2xi32> to vector<2x1xi32>
      %202 = tpu.iota {dimensions = array<i32: 1>} : vector<2x32xi32>
      %203 = vector.broadcast %201 : vector<2x1xi32> to vector<2x32xi32>
      %204 = arith.cmpi eq, %202, %203 : vector<2x32xi32>
      %205 = arith.extui %204 : vector<2x32xi1> to vector<2x32xi32>
      %206 = arith.sitofp %205 : vector<2x32xi32> to vector<2x32xf32>
      %cst_118 = arith.constant dense<0.000000e+00> : vector<2x32xf32>
      %207 = tpu.matmul %206, %2, %cst_118 {dimension_numbers = #tpu.dot_dimension_numbers<[1], [0], [0], [1], [0, 0, 1, 1], [], []>} : vector<2x32xf32>, vector<32x32xf32>, vector<2x32xf32> -> vector<2x32xf32>
      %208 = vector.broadcast %3 : vector<1x32xf32> to vector<2x32xf32>
      %209 = arith.addf %207, %208 : vector<2x32xf32>
      scf.yield %209 : vector<2x32xf32>
    } else {
      %c2_i32_115 = arith.constant 2 : i32
      %190 = arith.muli %c7_i32_99, %c2_i32_115 : i32
      %191 = arith.index_cast %190 : i32 to index
      %c0_116 = arith.constant 0 : index
      %192 = vector.load %arg13[%191, %c0_116] : memref<16x32xf32, #tpu.memory_space<vmem>>, vector<2x32xf32>
      scf.yield %192 : vector<2x32xf32>
    }
    %c7_i32_107 = arith.constant 7 : i32
    %cst_108 = arith.constant 0.000000e+00 : f32
    %183 = vector.broadcast %cst_108 : f32 to vector<2x128xf32>
    %c0_109 = arith.constant 0 : index
    %c0_110 = arith.constant 0 : index
    %184 = vector.load %arg11[%c0_109, %c0_110] : memref<16x128xf32, #tpu.memory_space<vmem>>, vector<2x128xf32>
    tpu.vector_store %arg11[%c0_109, %c0_110], %183 {strides = array<i32>} : memref<16x128xf32, #tpu.memory_space<vmem>>, vector<2x128xf32>,
    %c0_111 = arith.constant 0 : index
    %c0_112 = arith.constant 0 : index
    %185 = vector.load %arg14[%c0_111, %c0_112] : memref<14x32xf32, #tpu.memory_space<vmem>>, vector<14x32xf32>
    %cst_113 = arith.constant dense<0.000000e+00> : vector<14x128xf32>
    %186 = tpu.matmul %185, %4, %cst_113 {dimension_numbers = #tpu.dot_dimension_numbers<[1], [0], [0], [1], [0, 0, 1, 1], [], []>} : vector<14x32xf32>, vector<32x128xf32>, vector<14x128xf32> -> vector<14x128xf32>
    %187 = vector.broadcast %5 : vector<1x128xf32> to vector<14x128xf32>
    %188 = arith.addf %186, %187 : vector<14x128xf32>
    %c2 = arith.constant 2 : index
    %c0_114 = arith.constant 0 : index
    %189 = vector.load %arg11[%c2, %c0_114] : memref<16x128xf32, #tpu.memory_space<vmem>>, vector<14x128xf32>
    tpu.vector_store %arg11[%c2, %c0_114], %188 {strides = array<i32>} : memref<16x128xf32, #tpu.memory_space<vmem>>, vector<14x128xf32>,
    return
  }
}

</mosaic_0001>

<bundles_post_ra>
// kernel: seq2seq_forward.1
= control target key start
LH: loop header
LB: loop body
LE: loop exit
PB: predicated region body
PF: predicated region fallthrough
CT: control target
= control target key end

     0   :  { %16 = vsyncpa [#allocation7], 0  ;;  %s4005_s0 = inlined_call_operand.vmem [shape: s32[8], index: 0, kind: input, shape index: {}]   ;;  %s4006_s1 = inlined_call_operand.vmem [shape: s32[16,1], index: 1, kind: input, shape index: {}]   ;;  %s4007_s2 = inlined_call_operand.vmem [shape: s32[16,1], index: 2, kind: input, shape index: {}]   ;;  %s4008_s3 = inlined_call_operand.vmem [shape: f32[32,32], index: 3, kind: input, shape index: {}]   ;;  %s4009_s4 = inlined_call_operand.vmem [shape: f32[32,32], index: 4, kind: input, shape index: {}]   ;;  %s4010_s5 = inlined_call_operand.vmem [shape: f32[1,32], index: 5, kind: input, shape index: {}]   ;;  %s4011_s6 = inlined_call_operand.vmem [shape: f32[32,32], index: 6, kind: input, shape index: {}]   ;;  %s4012_s7 = inlined_call_operand.vmem [shape: f32[32,32], index: 7, kind: input, shape index: {}]   ;;  %s4013_s8 = inlined_call_operand.vmem [shape: f32[1,32], index: 8, kind: input, shape index: {}]   ;;  %s4014_s9 = inlined_call_operand.vmem [shape: f32[32,128], index: 9, kind: input, shape index: {}]   ;;  %s4015_s10 = inlined_call_operand.vmem [shape: f32[1,128], index: 10, kind: input, shape index: {}]   ;;  %s4016_s11 = inlined_call_operand.hbm [shape: f32[16,128], index: 11, kind: output, shape index: {}]  }
   0x1   :  { %17 = vsyncpa [#allocation6], 0  ;;  %s24_s19 = sshll.u32 %s4005_s0, 4  ;;  %s25_s19 = int_to_ptr.vmem [resolvable:$true] %s24_s19 }
   0x2   :  { %s3331_s20 = scalar_lea.vmem %s25_s19, 16  ;;  %p3336_p1 = scmp.lt.s32.totalorder %s25_s19, %s25_s19 }
   0x3   :  { %p3332_p0 = scmp.ne.s32.totalorder %s25_s19, %s3331_s20  ;;  %p3337_p2 = scmp.lt.s32.totalorder %s3331_s20, %s3331_s20 }
   0x5   :  { %p3338_p3 = por %p3337_p2, %p3336_p1 }
   0x7   :  { %p3339_p4 = pnand %p3338_p3, %p3332_p0 }
   0x9   :  { %3342 = shalt.err (!%p3339_p4)
}
   0xa   :  { %s3415_s21 = smov [#allocation5]  }
   0xb   :  { %27 = dma.vmem_to_smem %s25_s19, 16, %s3415_s21, [#allocation7]  }
   0xc   :  { %3387 = dma.done.wait [#allocation7], 16  }
   0xd   :  { %3388 = vsyncadd [#allocation7], 4294967280 }
   0xe   :  { %51 = sfence }
   0xf   :  { %v72_v0 = vld [vmem:[%s4006_s1] sm:$0xff]  ;;  %v3416_v2 = vmov 0   ;;  %v3508_v3 = vld [vmem:[%s4014_s9 + $0x8] sm:$0xff]  ;;  %v3513_v4 = vld [vmem:[%s4014_s9 + $0x10] sm:$0xff]  ;;  %v3417_v12 = vmov 0.0   ;;  %v70_v15 = vlaneseq  ;;  %vm97_vm0 = vcmask 261120  }
  0x10   :  { %v3503_v1 = vld [vmem:[%s4014_s9] sm:$0xff]  ;;  %3299 = vset.pattern.permute.xlu0 %v3416_v2  ;;  %v3518_v5 = vld [vmem:[%s4014_s9 + $0x18] sm:$0xff]  ;;  %3300 = vset.pattern.permute.xlu1 %v3416_v2  ;;  %v88_v8 = vld [vmem:[%s4008_s3 + $0x10] sm:$0xff]  ;;  %vm3418_vm3 = vmmov 0   ;;  %s3742_s24 = sld [smem:[#allocation5 + $0x1]]  ;;  %vm968_vm6 = vcmask 254976  }
  0x11   :  { %75 = vperm.xlu0 %3299, %v72_v0   ;;  %v3523_v6 = vld [vmem:[%s4015_s10] sm:$0x1]  ;;  %v89_v7 = vld [vmem:[%s4008_s3 + $0x18] sm:$0xff]  ;;  %v73_v9 = vld [vmem:[%s4006_s1 + $0x8] sm:$0xff]  ;;  %v3548_v16 = vand.u32 127, %v70_v15 }
  0x12   :  { %2866 = vmatprep.subr.mxu0 %v89_v7  ;;  %v87_v10 = vld [vmem:[%s4008_s3 + $0x8] sm:$0xff]  ;;  %v86_v11 = vld [vmem:[%s4008_s3] sm:$0xff]  ;;  %v3557_v20 = vld [vmem:[%s4009_s4 + $0x18] sm:$0xff] }
  0x13   :  { %2867 = vmatpush3.msra.mxu0 %v89_v7  ;;  %v181_v13 = vld [vmem:[%s4007_s2] sm:$0xff]  ;;  %v182_v14 = vld [vmem:[%s4007_s2 + $0x8] sm:$0xff]  ;;  %v3564_v22 = vld [vmem:[%s4009_s4 + $0x10] sm:$0xff] }
  0x14   :  { %2868 = vmatprep.subr.mxu0 %v88_v8  ;;  %184 = vperm.xlu1 %3300, %v181_v13   ;;  %v3573_v23 = vld [vmem:[%s4009_s4 + $0x8] sm:$0xff]  ;;  %v3580_v24 = vld [vmem:[%s4009_s4] sm:$0xff]  ;;  %v3600_v25 = vld [vmem:[%s4011_s6 + $0x18] sm:$0xff] }
  0x15   :  { %78 = vperm.xlu0 %3299, %v73_v9   ;;  %2869 = vmatpush3.msra.mxu0 %v88_v8  ;;  %v3605_v26 = vld [vmem:[%s4011_s6 + $0x10] sm:$0xff]  ;;  %v3615_v28 = vld [vmem:[%s4011_s6 + $0x8] sm:$0xff]  ;;  %v3622_v30 = vld [vmem:[%s4011_s6] sm:$0xff] }
  0x16   :  { %2870 = vmatprep.subr.mxu0 %v87_v10  ;;  %2877 = vmatprep.subr.mxu1 %v3600_v25  ;;  %v2659_v33 = vld [vmem:[%s4010_s5] ss:$0 sm:$0xff]  ;;  %p2676_p5 = scmp.ne.s32.totalorder %s3742_s24, 0 }
  0x17   :  { %2871 = vmatpush3.msra.mxu0 %v87_v10  ;;  %2878 = vmatpush3.msra.mxu1 %v3600_v25  ;;  %v3661_v43 = vld [vmem:[%s4013_s8] ss:$0 sm:$0xff] }
  0x18   :  { %2872 = vmatprep.subr.mxu0 %v86_v11  ;;  %187 = vperm.xlu1 %3300, %v182_v14  }
  0x19   :  { %2873 = vmatpush3.msra.mxu0 %v86_v11  ;;  %2879 = vmatprep.subr.mxu1 %v3605_v26 }
  0x1a   :  { %2888 = vmatprep.subr.mxu0 %v3417_v12  ;;  %2880 = vmatpush3.msra.mxu1 %v3605_v26 }
  0x1b   :  { %2881 = vmatprep.subr.mxu1 %v3615_v28 }
  0x1c   :  { %2882 = vmatpush3.msra.mxu1 %v3615_v28 }
  0x1d   :  { %2883 = vmatprep.subr.mxu1 %v3622_v30 }
  0x1e   :  { %2884 = vmatpush3.msra.mxu1 %v3622_v30 }
  0x1f   :  { %2899 = vmatprep.subr.mxu1 %v3417_v12 }
  0x8c   :  { %v76_v17 = vpop.permute.xlu0 %75 }
  0x8d   :  { %vm80_vm1 = vcmp.eq.s32.totalorder %v3548_v16, %v76_v17 }
  0x8e   :  { %v2657_v18 = vsel %vm80_vm1, 1.0, %v3417_v12 }
  0x8f   :  { %2874 = vmatprep.mubr.msk.f32.mxu0 %vm97_vm0, %v2657_v18  ;;  %v185_v27 = vpop.permute.xlu1 %184 }
  0x90   :  { %v79_v19 = vpop.permute.xlu0 %78  ;;  %vm189_vm4 = vcmp.eq.s32.totalorder %v3548_v16, %v185_v27  ;;  %v3736_v27 = vld [vmem:[%s4012_s7] sm:$0xff] }
  0x91   :  { %vm81_vm2 = vcmp.eq.s32.totalorder %v3548_v16, %v79_v19  ;;  %v2662_v31 = vsel %vm189_vm4, 1.0, %v3417_v12 }
  0x92   :  { %v2658_v21 = vsel %vm81_vm2, 1.0, %v3417_v12  ;;  %2885 = vmatprep.mubr.msk.f32.mxu1 %vm97_vm0, %v2662_v31 }
  0x93   :  { %2875 = vmatmul.mubr.msk.f32.vlgmr.msra.gmra.mxu0 %vm97_vm0, %v2658_v21  ;;  %v188_v29 = vpop.permute.xlu1 %187 }
  0x94   :  { %2889 = vmatpush3.msra.mxu0 %v3557_v20  ;;  %2896 = vmatprep.mubr.msk.f32.mxu0 %vm3418_vm3, %v3417_v12  ;;  %vm190_vm5 = vcmp.eq.s32.totalorder %v3548_v16, %v188_v29 }
  0x95   :  { %2890 = vmatprep.subr.mxu0 %v3417_v12  ;;  %v2663_v32 = vsel %vm190_vm5, 1.0, %v3417_v12 }
  0x96   :  { %2891 = vmatpush3.msra.mxu0 %v3564_v22  ;;  %2886 = vmatmul.mubr.msk.f32.vlgmr.msra.gmra.mxu1 %vm97_vm0, %v2663_v32 }
  0x97   :  { %2892 = vmatprep.subr.mxu0 %v3417_v12  ;;  %2900 = vmatpush3.msra.mxu1 %v3557_v20 }
  0x98   :  { %2893 = vmatpush3.msra.mxu0 %v3573_v23  ;;  %2907 = vmatprep.mubr.msk.f32.mxu1 %vm3418_vm3, %v3417_v12 }
  0x99   :  { %2894 = vmatprep.subr.mxu0 %v3417_v12  ;;  %2901 = vmatprep.subr.mxu1 %v3417_v12 }
  0x9a   :  { %2895 = vmatpush3.msra.mxu0 %v3580_v24  ;;  %2902 = vmatpush3.msra.mxu1 %v3564_v22 }
  0x9b   :  { %2897 = vmatmul.mubr.f32.vlgmr.msra.gmra.mxu0 %v3417_v12  ;;  %2910 = vmatprep.subr.mxu0 %v3417_v12 }
  0x9c   :  { %2911 = vmatpush3.msra.mxu0 %v3557_v20  ;;  %2918 = vmatprep.mubr.msk.f32.mxu0 %vm3418_vm3, %v3417_v12 }
  0x9d   :  { %2912 = vmatprep.subr.mxu0 %v3417_v12  ;;  %2903 = vmatprep.subr.mxu1 %v3417_v12 }
  0x9e   :  { %2913 = vmatpush3.msra.mxu0 %v3564_v22  ;;  %2904 = vmatpush3.msra.mxu1 %v3573_v23 }
  0x9f   :  { %2914 = vmatprep.subr.mxu0 %v3417_v12  ;;  %2905 = vmatprep.subr.mxu1 %v3417_v12 }
  0xa0   :  { %2915 = vmatpush3.msra.mxu0 %v3573_v23  ;;  %2906 = vmatpush3.msra.mxu1 %v3580_v24 }
  0xa1   :  { %2916 = vmatprep.subr.mxu0 %v3417_v12  ;;  %2921 = vmatprep.subr.mxu1 %v3417_v12 }
  0xa2   :  { %2917 = vmatpush3.msra.mxu0 %v3580_v24 }
  0xa3   :  { %2932 = vmatprep.subr.mxu0 %v3417_v12 }
 0x153   :  { %v2876_v34 = vpop.f32.mrf.mxu0 }
 0x154   :  { %v176_v35 = vadd.f32 %v2876_v34, %v2659_v33 }
 0x155   :  { %v170_v36 = vpop.f32.mrf.mxu0 }
 0x156   :  { %180 = vst.msk [vmem:[#allocation2 + $0x8] sm:$0xff] %vm97_vm0, %v176_v35  ;;  %v171_v37 = vadd.f32 %v2659_v33, %v170_v36  ;;  %v2887_v44 = vpop.f32.mrf.mxu1 }
 0x157   :  { %v279_v45 = vadd.f32 %v2887_v44, %v3661_v43 }
 0x158   :  { %179 = vst.msk [vmem:[#allocation2] sm:$0xff] %vm97_vm0, %v171_v37  ;;  %v273_v46 = vpop.f32.mrf.mxu1 }
 0x159   :  { %283 = vst.msk [vmem:[#allocation3 + $0x8] sm:$0xff] %vm97_vm0, %v279_v45  ;;  %v274_v47 = vadd.f32 %v3661_v43, %v273_v46 }
 0x15b   :  { %v354_v38 = vpop.f32.mrf.mxu0  ;;  %282 = vst.msk [vmem:[#allocation3] sm:$0xff] %vm97_vm0, %v274_v47 }
 0x15d   :  { %v2898_v39 = vpop.f32.mrf.mxu0  ;;  %v588_v63 = vld [vmem:[#allocation2 + $0x8] sm:$0x3]  ;;  %v664_v9 = vld [vmem:[#allocation2 + $0xa] sm:$0x3]  ;;  %v740_v17 = vld [vmem:[#allocation2 + $0xc] sm:$0x3] }
 0x15e   :  { %v816_v29 = vld [vmem:[#allocation2 + $0xe] sm:$0x3] }
 0x15f   :  { %v284_v40 = vld [vmem:[#allocation2] sm:$0x3]  ;;  %v360_v48 = vld [vmem:[#allocation2 + $0x2] sm:$0x3]  ;;  %v436_v53 = vld [vmem:[#allocation2 + $0x4] sm:$0x3] }
 0x160   :  { %v358_v41 = vadd.f32 %v354_v38, %v284_v40  ;;  %v512_v58 = vld [vmem:[#allocation2 + $0x6] sm:$0x3]  ;;  %v3391_v40 = vmov 0  }
 0x162   :  { %3301 = vtanh.f32 %v358_v41  ;;  %v892_v35 = vld [vmem:[#allocation3] sm:$0x3] }
 0x16f   :  { %v3302_v42 = vpop.eup %3301 }
 0x170   :  { %2908 = vmatmul.mubr.msk.f32.vlgmr.msra.gmra.mxu1 %vm97_vm0, %v3302_v42 }
 0x171   :  { %2922 = vmatpush3.msra.mxu1 %v3557_v20  ;;  %2929 = vmatprep.mubr.msk.f32.mxu1 %vm3418_vm3, %v3417_v12 }
 0x172   :  { %2923 = vmatprep.subr.mxu1 %v3417_v12 }
 0x173   :  { %2924 = vmatpush3.msra.mxu1 %v3564_v22 }
 0x174   :  { %2925 = vmatprep.subr.mxu1 %v3417_v12 }
 0x175   :  { %2926 = vmatpush3.msra.mxu1 %v3573_v23 }
 0x176   :  { %2927 = vmatprep.subr.mxu1 %v3417_v12 }
 0x177   :  { %2928 = vmatpush3.msra.mxu1 %v3580_v24 }
 0x178   :  { %2943 = vmatprep.subr.mxu1 %v3417_v12 }
 0x230   :  { %v430_v49 = vpop.f32.mrf.mxu1 }
 0x231   :  { %v434_v50 = vadd.f32 %v430_v49, %v360_v48 }
 0x232   :  { %v2909_v51 = vpop.f32.mrf.mxu1 }
 0x233   :  { %3303 = vtanh.f32 %v434_v50 }
 0x240   :  { %v3304_v52 = vpop.eup %3303 }
 0x241   :  { %2919 = vmatmul.mubr.msk.f32.vlgmr.msra.gmra.mxu0 %vm97_vm0, %v3304_v52 }
 0x242   :  { %2933 = vmatpush3.msra.mxu0 %v3557_v20  ;;  %2940 = vmatprep.mubr.msk.f32.mxu0 %vm3418_vm3, %v3417_v12 }
 0x243   :  { %2934 = vmatprep.subr.mxu0 %v3417_v12 }
 0x244   :  { %2935 = vmatpush3.msra.mxu0 %v3564_v22 }
 0x245   :  { %2936 = vmatprep.subr.mxu0 %v3417_v12 }
 0x246   :  { %2937 = vmatpush3.msra.mxu0 %v3573_v23 }
 0x247   :  { %2938 = vmatprep.subr.mxu0 %v3417_v12 }
 0x248   :  { %2939 = vmatpush3.msra.mxu0 %v3580_v24 }
 0x249   :  { %2954 = vmatprep.subr.mxu0 %v3417_v12 }
 0x301   :  { %v506_v54 = vpop.f32.mrf.mxu0 }
 0x302   :  { %v510_v55 = vadd.f32 %v506_v54, %v436_v53 }
 0x303   :  { %v2920_v56 = vpop.f32.mrf.mxu0 }
 0x304   :  { %3305 = vtanh.f32 %v510_v55 }
 0x311   :  { %v3306_v57 = vpop.eup %3305 }
 0x312   :  { %2930 = vmatmul.mubr.msk.f32.vlgmr.msra.gmra.mxu1 %vm97_vm0, %v3306_v57 }
 0x313   :  { %2944 = vmatpush3.msra.mxu1 %v3557_v20  ;;  %2951 = vmatprep.mubr.msk.f32.mxu1 %vm3418_vm3, %v3417_v12 }
 0x314   :  { %2945 = vmatprep.subr.mxu1 %v3417_v12 }
 0x315   :  { %2946 = vmatpush3.msra.mxu1 %v3564_v22 }
 0x316   :  { %2947 = vmatprep.subr.mxu1 %v3417_v12 }
 0x317   :  { %2948 = vmatpush3.msra.mxu1 %v3573_v23 }
 0x318   :  { %2949 = vmatprep.subr.mxu1 %v3417_v12 }
 0x319   :  { %2950 = vmatpush3.msra.mxu1 %v3580_v24 }
 0x31a   :  { %2965 = vmatprep.subr.mxu1 %v3417_v12 }
 0x3d2   :  { %v582_v59 = vpop.f32.mrf.mxu1 }
 0x3d3   :  { %v586_v60 = vadd.f32 %v582_v59, %v512_v58 }
 0x3d4   :  { %v2931_v61 = vpop.f32.mrf.mxu1 }
 0x3d5   :  { %3307 = vtanh.f32 %v586_v60 }
 0x3e2   :  { %v3308_v62 = vpop.eup %3307 }
 0x3e3   :  { %2941 = vmatmul.mubr.msk.f32.vlgmr.msra.gmra.mxu0 %vm97_vm0, %v3308_v62 }
 0x3e4   :  { %2955 = vmatpush3.msra.mxu0 %v3557_v20  ;;  %2962 = vmatprep.mubr.msk.f32.mxu0 %vm3418_vm3, %v3417_v12 }
 0x3e5   :  { %2956 = vmatprep.subr.mxu0 %v3417_v12 }
 0x3e6   :  { %2957 = vmatpush3.msra.mxu0 %v3564_v22 }
 0x3e7   :  { %2958 = vmatprep.subr.mxu0 %v3417_v12 }
 0x3e8   :  { %2959 = vmatpush3.msra.mxu0 %v3573_v23 }
 0x3e9   :  { %2960 = vmatprep.subr.mxu0 %v3417_v12 }
 0x3ea   :  { %2961 = vmatpush3.msra.mxu0 %v3580_v24 }
 0x3eb   :  { %2976 = vmatprep.subr.mxu0 %v3417_v12 }
 0x4a3   :  { %v658_v0 = vpop.f32.mrf.mxu0 }
 0x4a4   :  { %v662_v2 = vadd.f32 %v658_v0, %v588_v63 }
 0x4a5   :  { %v2942_v7 = vpop.f32.mrf.mxu0 }
 0x4a6   :  { %3309 = vtanh.f32 %v662_v2 }
 0x4b3   :  { %v3310_v8 = vpop.eup %3309 }
 0x4b4   :  { %2952 = vmatmul.mubr.msk.f32.vlgmr.msra.gmra.mxu1 %vm97_vm0, %v3310_v8 }
 0x4b5   :  { %2966 = vmatpush3.msra.mxu1 %v3557_v20  ;;  %2973 = vmatprep.mubr.msk.f32.mxu1 %vm3418_vm3, %v3417_v12 }
 0x4b6   :  { %2967 = vmatprep.subr.mxu1 %v3417_v12 }
 0x4b7   :  { %2968 = vmatpush3.msra.mxu1 %v3564_v22  ;;  %v3717_v22 = vld [vmem:[%s4012_s7 + $0x18] sm:$0xff] }
 0x4b8   :  { %2969 = vmatprep.subr.mxu1 %v3417_v12 }
 0x4b9   :  { %2970 = vmatpush3.msra.mxu1 %v3573_v23  ;;  %v3722_v23 = vld [vmem:[%s4012_s7 + $0x10] sm:$0xff] }
 0x4ba   :  { %2971 = vmatprep.subr.mxu1 %v3417_v12 }
 0x4bb   :  { %2972 = vmatpush3.msra.mxu1 %v3580_v24  ;;  %v3729_v24 = vld [vmem:[%s4012_s7 + $0x8] sm:$0xff] }
 0x574   :  { %v734_v10 = vpop.f32.mrf.mxu1 }
 0x575   :  { %v738_v11 = vadd.f32 %v734_v10, %v664_v9 }
 0x576   :  { %v2953_v13 = vpop.f32.mrf.mxu1 }
 0x577   :  { %3311 = vtanh.f32 %v738_v11 }
 0x584   :  { %v3312_v14 = vpop.eup %3311 }
 0x585   :  { %2963 = vmatmul.mubr.msk.f32.vlgmr.msra.gmra.mxu0 %vm97_vm0, %v3312_v14 }
 0x586   :  { %2984 = vmatprep.mubr.msk.f32.mxu0 %vm3418_vm3, %v3417_v12  ;;  %2977 = vmatpush3.msra.mxu0 %v3717_v22 }
 0x587   :  { %2978 = vmatprep.subr.mxu0 %v3417_v12 }
 0x588   :  { %2979 = vmatpush3.msra.mxu0 %v3722_v23 }
 0x589   :  { %2980 = vmatprep.subr.mxu0 %v3417_v12 }
 0x58a   :  { %2981 = vmatpush3.msra.mxu0 %v3729_v24 }
 0x58b   :  { %2982 = vmatprep.subr.mxu0 %v3417_v12 }
 0x58c   :  { %2983 = vmatpush3.msra.mxu0 %v3736_v27 }
 0x645   :  { %v810_v18 = vpop.f32.mrf.mxu0 }
 0x646   :  { %v814_v19 = vadd.f32 %v810_v18, %v740_v17 }
 0x647   :  { %v2964_v20 = vpop.f32.mrf.mxu0 }
 0x648   :  { %3313 = vtanh.f32 %v814_v19 }
 0x655   :  { %v3314_v21 = vpop.eup %3313 }
 0x656   :  { %2974 = vmatmul.mubr.msk.f32.vlgmr.msra.gmra.mxu1 %vm97_vm0, %v3314_v21 }
 0x716   :  { %v886_v31 = vpop.f32.mrf.mxu1 }
 0x717   :  { %v890_v32 = vadd.f32 %v886_v31, %v816_v29 }
 0x718   :  { %v2975_v33 = vpop.f32.mrf.mxu1 }
 0x719   :  { %3315 = vtanh.f32 %v890_v32 }
 0x726   :  { %v3316_v34 = vpop.eup %3315 }
 0x727   :  { %2985 = vmatmul.mubr.msk.f32.vlgmr.msra.gmra.mxu0 %vm97_vm0, %v3316_v34 }
 0x7e7   :  { %v962_v36 = vpop.f32.mrf.mxu0 }
 0x7e8   :  { %v966_v37 = vadd.f32 %v962_v36, %v892_v35 }
 0x7e9   :  { %v2986_v38 = vpop.f32.mrf.mxu0 }
 0x7ea   :  { %3317 = vtanh.f32 %v966_v37 }
 0x7f4   :  { %974 = sbr.rel (%p2676_p5) target bundleno = 2870 (0xb36), region = 53 }
 0x7f7   :  { %v3744_v39 = vpop.eup %3317 }
 0x7f8   :  { %969 = vst.msk [vmem:[#allocation4] sm:$0x3] %vm968_vm6, %v3744_v39 }
 0x7f9   :  { %v3419_v41 = vmov 0.0   ;;  %vm3420_vm7 = vmmov 0   ;;  %v977_v42 = vshrl.u32 %v70_v15, 7  ;;  %vm1054_vm8 = vcmask 1041408  }
 0x7fa   :  { %2987 = vmatprep.subr.mxu0 %v3419_v41  ;;  %2995 = vmatprep.mubr.msk.f32.mxu0 %vm3420_vm7, %v3419_v41 }
 0x7fb   :  { %2988 = vmatpush3.msra.mxu0 %v3518_v5  ;;  %2998 = vmatprep.subr.mxu1 %v3419_v41  ;;  %v978_v44 = vsub.s32 0, %v977_v42 }
 0x7fc   :  { %2989 = vmatprep.subr.mxu0 %v3419_v41  ;;  %2999 = vmatpush3.msra.mxu1 %v3600_v25 }
 0x7fd   :  { %2990 = vmatpush3.msra.mxu0 %v3513_v4  ;;  %3000 = vmatprep.subr.mxu1 %v3419_v41  ;;  %v979_v45 = vrot.slane %v3523_v6, %v978_v44 }
 0x7fe   :  { %2991 = vmatprep.subr.mxu0 %v3419_v41  ;;  %3001 = vmatpush3.msra.mxu1 %v3605_v26 }
 0x7ff   :  { %2992 = vmatpush3.msra.mxu0 %v3508_v3  ;;  %3002 = vmatprep.subr.mxu1 %v3419_v41 }
 0x800   :  { %2993 = vmatprep.subr.mxu0 %v3419_v41  ;;  %3003 = vmatpush3.msra.mxu1 %v3615_v28 }
 0x801   :  { %2994 = vmatpush3.msra.mxu0 %v3503_v1  ;;  %3004 = vmatprep.subr.mxu1 %v3419_v41 }
 0x802   :  { %2996 = vmatmul.mubr.msk.f32.vlgmr.msra.gmra.mxu0 %vm97_vm0, %v3744_v39  ;;  %3005 = vmatpush3.msra.mxu1 %v3622_v30 }
 0x803   :  { %3006 = vmatprep.mubr.msk.f32.mxu1 %vm3420_vm7, %v3419_v41 }
 0x8c2   :  { %v1050_v46 = vpop.f32.mrf.mxu0 }
 0x8c3   :  { %v1051_v47 = vadd.f32 %v1050_v46, %v979_v45 }
 0x8c4   :  { %v2997_v48 = vpop.f32.mrf.mxu0 }
 0x8c5   :  { %v1055_v49 = vsel %vm1054_vm8, %v1051_v47, -inf }
 0x8c6   :  { %1056 = vmax.xlane.f32.xlu0 %v1055_v49 }
 0x94f   :  { %v1057_v50 = vpop.xlane.xlu0 %1056 }
 0x950   :  { %vm1058_vm9 = vcmp.eq.f32.partialorder %v1051_v47, %v1057_v50 }
 0x951   :  { %v1059_v51 = vsel %vm1058_vm9, %v3548_v16, 128 }
 0x952   :  { %v1060_v52 = vsel %vm1054_vm8, %v1059_v51, 2147483647 }
 0x953   :  { %v1062_v53 = vshra.s32 %v1060_v52, 16  ;;  %v1061_v55 = vand.u32 65535, %v1060_v52 }
 0x955   :  { %v1064_v54 = vcvt.s32.f32 %v1062_v53  ;;  %v1063_v57 = vcvt.s32.f32 %v1061_v55 }
 0x957   :  { %1065 = vmin.xlane.f32.xlu0 %v1064_v54 }
 0x9e0   :  { %v1066_v56 = vpop.xlane.xlu0 %1065 }
 0x9e1   :  { %vm1067_vm10 = vcmp.eq.f32.partialorder %v1064_v54, %v1066_v56  ;;  %v1072_v59 = vcvt.f32.s32 %v1066_v56 }
 0x9e2   :  { %v1068_v58 = vsel %vm1067_vm10, %v1063_v57, inf }
 0x9e3   :  { %1069 = vmin.xlane.f32.xlu1 %v1068_v58  ;;  %v1073_v61 = vshll.u32 %v1072_v59, 16 }
 0xa6c   :  { %v1070_v60 = vpop.xlane.xlu1 %1069 }
 0xa6d   :  { %v1071_v62 = vcvt.f32.s32 %v1070_v60 }
 0xa6f   :  { %v1074_v63 = vadd.s32 %v1073_v61, %v1071_v62 }
 0xa71   :  { %vm1075_vm11 = vcmp.eq.s32.totalorder %v3548_v16, %v1074_v63 }
 0xa72   :  { %v2678_v0 = vsel %vm1075_vm11, 1.0, %v3419_v41 }
 0xa73   :  { %3007 = vmatmul.mubr.msk.f32.vlgmr.msra.gmra.mxu1 %vm97_vm0, %v2678_v0 }
 0xb33   :  { %v1147_v2 = vpop.f32.mrf.mxu1 }
 0xb34   :  { %v1148_v40 = vadd.f32 %v3661_v43, %v1147_v2  }
 0xb35   :  { %v3008_v7 = vpop.f32.mrf.mxu1 }
 0xb36 PF:  { %3009 = vmatprep.subr.mxu0 %v3417_v12  ;;  %3017 = vmatprep.mubr.msk.f32.mxu0 %vm3418_vm3, %v3417_v12  ;;  %s3781_s7 = sld [smem:[#allocation5 + $0x2]]  ;;  %v1155_v9 = vld [vmem:[#allocation3 + $0x2] sm:$0x3]  ;;  %v3395_v18 = vmov 0   ;;  %v3393_v40 = vphi %v3391_v40, %v1148_v40  }
 0xb37   :  { %3010 = vmatpush3.msra.mxu0 %v3717_v22  ;;  %s3197_s3 = scalar_select %p2676_p5, 1, 0 }
 0xb38   :  { %3011 = vmatprep.subr.mxu0 %v3417_v12 }
 0xb39   :  { %3012 = vmatpush3.msra.mxu0 %v3722_v23  ;;  %v3198_v8 = vstv %s3197_s3 }
 0xb3a   :  { %3013 = vmatprep.subr.mxu0 %v3417_v12  ;;  %vm3199_vm12 = vcmp.ne.s32.totalorder %v3198_v8, 0 }
 0xb3b   :  { %3014 = vmatpush3.msra.mxu0 %v3729_v24  ;;  %v3200_v10 = vsel %vm3199_vm12, %v1155_v9, %v3393_v40 }
 0xb3c   :  { %3015 = vmatprep.subr.mxu0 %v3417_v12  ;;  %p2682_p6 = scmp.ne.s32.totalorder %s3781_s7, 0 }
 0xb3d   :  { %3016 = vmatpush3.msra.mxu0 %v3736_v27 }
 0xb3e   :  { %3018 = vmatmul.mubr.msk.f32.vlgmr.msra.gmra.mxu0 %vm97_vm0, %v3744_v39 }
 0xbfe   :  { %v1226_v11 = vpop.f32.mrf.mxu0 }
 0xbff   :  { %v1230_v13 = vadd.f32 %v3200_v10, %v1226_v11 }
 0xc00   :  { %v3019_v14 = vpop.f32.mrf.mxu0 }
 0xc01   :  { %3319 = vtanh.f32 %v1230_v13 }
 0xc0b   :  { %1237 = sbr.rel (%p2682_p6) target bundleno = 3917 (0xf4d), region = 61 }
 0xc0e   :  { %v3785_v17 = vpop.eup %3319 }
 0xc0f   :  { %1232 = vst.msk [vmem:[#allocation4 + $0x2] sm:$0x3] %vm968_vm6, %v3785_v17 }
 0xc10   :  { %v3421_v19 = vmov 0.0   ;;  %vm3422_vm13 = vmmov 0   ;;  %v1240_v20 = vshrl.u32 %v70_v15, 7  ;;  %vm1317_vm14 = vcmask 1041408  }
 0xc11   :  { %3020 = vmatprep.subr.mxu0 %v3421_v19  ;;  %3028 = vmatprep.mubr.msk.f32.mxu0 %vm3422_vm13, %v3421_v19 }
 0xc12   :  { %3021 = vmatpush3.msra.mxu0 %v3518_v5  ;;  %3031 = vmatprep.subr.mxu1 %v3421_v19  ;;  %v1241_v21 = vsub.s32 0, %v1240_v20 }
 0xc13   :  { %3022 = vmatprep.subr.mxu0 %v3421_v19  ;;  %3032 = vmatpush3.msra.mxu1 %v3600_v25 }
 0xc14   :  { %3023 = vmatpush3.msra.mxu0 %v3513_v4  ;;  %3033 = vmatprep.subr.mxu1 %v3421_v19  ;;  %v1242_v29 = vrot.slane %v3523_v6, %v1241_v21 }
 0xc15   :  { %3024 = vmatprep.subr.mxu0 %v3421_v19  ;;  %3034 = vmatpush3.msra.mxu1 %v3605_v26 }
 0xc16   :  { %3025 = vmatpush3.msra.mxu0 %v3508_v3  ;;  %3035 = vmatprep.subr.mxu1 %v3421_v19 }
 0xc17   :  { %3026 = vmatprep.subr.mxu0 %v3421_v19  ;;  %3036 = vmatpush3.msra.mxu1 %v3615_v28 }
 0xc18   :  { %3027 = vmatpush3.msra.mxu0 %v3503_v1  ;;  %3037 = vmatprep.subr.mxu1 %v3421_v19 }
 0xc19   :  { %3029 = vmatmul.mubr.msk.f32.vlgmr.msra.gmra.mxu0 %vm97_vm0, %v3785_v17  ;;  %3038 = vmatpush3.msra.mxu1 %v3622_v30 }
 0xc1a   :  { %3039 = vmatprep.mubr.msk.f32.mxu1 %vm3422_vm13, %v3421_v19 }
 0xcd9   :  { %v1313_v31 = vpop.f32.mrf.mxu0 }
 0xcda   :  { %v1314_v32 = vadd.f32 %v1313_v31, %v1242_v29 }
 0xcdb   :  { %v3030_v33 = vpop.f32.mrf.mxu0 }
 0xcdc   :  { %v1318_v34 = vsel %vm1317_vm14, %v1314_v32, -inf }
 0xcdd   :  { %1319 = vmax.xlane.f32.xlu0 %v1318_v34 }
 0xd66   :  { %v1320_v35 = vpop.xlane.xlu0 %1319 }
 0xd67   :  { %vm1321_vm15 = vcmp.eq.f32.partialorder %v1314_v32, %v1320_v35 }
 0xd68   :  { %v1322_v36 = vsel %vm1321_vm15, %v3548_v16, 128 }
 0xd69   :  { %v1323_v37 = vsel %vm1317_vm14, %v1322_v36, 2147483647 }
 0xd6a   :  { %v1325_v38 = vshra.s32 %v1323_v37, 16  ;;  %v1324_v40 = vand.u32 65535, %v1323_v37 }
 0xd6c   :  { %v1327_v39 = vcvt.s32.f32 %v1325_v38  ;;  %v1326_v42 = vcvt.s32.f32 %v1324_v40 }
 0xd6e   :  { %1328 = vmin.xlane.f32.xlu0 %v1327_v39 }
 0xdf7   :  { %v1329_v41 = vpop.xlane.xlu0 %1328 }
 0xdf8   :  { %vm1330_vm1 = vcmp.eq.f32.partialorder %v1327_v39, %v1329_v41  ;;  %v1335_v45 = vcvt.f32.s32 %v1329_v41 }
 0xdf9   :  { %v1331_v44 = vsel %vm1330_vm1, %v1326_v42, inf }
 0xdfa   :  { %1332 = vmin.xlane.f32.xlu1 %v1331_v44  ;;  %v1336_v47 = vshll.u32 %v1335_v45, 16 }
 0xe83   :  { %v1333_v46 = vpop.xlane.xlu1 %1332 }
 0xe84   :  { %v1334_v48 = vcvt.f32.s32 %v1333_v46 }
 0xe86   :  { %v1337_v49 = vadd.s32 %v1336_v47, %v1334_v48 }
 0xe88   :  { %vm1338_vm2 = vcmp.eq.s32.totalorder %v3548_v16, %v1337_v49 }
 0xe89   :  { %v2684_v50 = vsel %vm1338_vm2, 1.0, %v3421_v19 }
 0xe8a   :  { %3040 = vmatmul.mubr.msk.f32.vlgmr.msra.gmra.mxu1 %vm97_vm0, %v2684_v50 }
 0xf4a   :  { %v1410_v51 = vpop.f32.mrf.mxu1 }
 0xf4b   :  { %v1411_v18 = vadd.f32 %v3661_v43, %v1410_v51  }
 0xf4c   :  { %v3041_v52 = vpop.f32.mrf.mxu1 }
 0xf4d PF:  { %3042 = vmatprep.subr.mxu0 %v3417_v12  ;;  %3050 = vmatprep.mubr.msk.f32.mxu0 %vm3418_vm3, %v3417_v12  ;;  %s3822_s25 = sld [smem:[#allocation5 + $0x3]]  ;;  %v1418_v54 = vld [vmem:[#allocation3 + $0x4] sm:$0x3]  ;;  %v3399_v60 = vmov 0   ;;  %v3397_v18 = vphi %v3395_v18, %v1411_v18  }
 0xf4e   :  { %3043 = vmatpush3.msra.mxu0 %v3717_v22  ;;  %s3202_s2 = scalar_select %p2682_p6, 1, 0 }
 0xf4f   :  { %3044 = vmatprep.subr.mxu0 %v3417_v12 }
 0xf50   :  { %3045 = vmatpush3.msra.mxu0 %v3722_v23  ;;  %v3203_v53 = vstv %s3202_s2 }
 0xf51   :  { %3046 = vmatprep.subr.mxu0 %v3417_v12  ;;  %vm3204_vm4 = vcmp.ne.s32.totalorder %v3203_v53, 0 }
 0xf52   :  { %3047 = vmatpush3.msra.mxu0 %v3729_v24  ;;  %v3205_v55 = vsel %vm3204_vm4, %v1418_v54, %v3397_v18 }
 0xf53   :  { %3048 = vmatprep.subr.mxu0 %v3417_v12  ;;  %p2688_p7 = scmp.ne.s32.totalorder %s3822_s25, 0 }
 0xf54   :  { %3049 = vmatpush3.msra.mxu0 %v3736_v27 }
 0xf55   :  { %3051 = vmatmul.mubr.msk.f32.vlgmr.msra.gmra.mxu0 %vm97_vm0, %v3785_v17 }
0x1015   :  { %v1489_v56 = vpop.f32.mrf.mxu0 }
0x1016   :  { %v1493_v57 = vadd.f32 %v3205_v55, %v1489_v56 }
0x1017   :  { %v3052_v58 = vpop.f32.mrf.mxu0 }
0x1018   :  { %3321 = vtanh.f32 %v1493_v57 }
0x1022   :  { %1500 = sbr.rel (%p2688_p7) target bundleno = 4964 (0x1364), region = 69 }
0x1025   :  { %v3826_v59 = vpop.eup %3321 }
0x1026   :  { %1495 = vst.msk [vmem:[#allocation4 + $0x4] sm:$0x3] %vm968_vm6, %v3826_v59 }
0x1027   :  { %v3423_v61 = vmov 0.0   ;;  %vm3424_vm5 = vmmov 0   ;;  %v1503_v62 = vshrl.u32 %v70_v15, 7  ;;  %vm1580_vm7 = vcmask 1041408  }
0x1028   :  { %3053 = vmatprep.subr.mxu0 %v3423_v61  ;;  %3061 = vmatprep.mubr.msk.f32.mxu0 %vm3424_vm5, %v3423_v61 }
0x1029   :  { %3054 = vmatpush3.msra.mxu0 %v3518_v5  ;;  %3064 = vmatprep.subr.mxu1 %v3423_v61  ;;  %v1504_v63 = vsub.s32 0, %v1503_v62 }
0x102a   :  { %3055 = vmatprep.subr.mxu0 %v3423_v61  ;;  %3065 = vmatpush3.msra.mxu1 %v3600_v25 }
0x102b   :  { %3056 = vmatpush3.msra.mxu0 %v3513_v4  ;;  %3066 = vmatprep.subr.mxu1 %v3423_v61  ;;  %v1505_v0 = vrot.slane %v3523_v6, %v1504_v63 }
0x102c   :  { %3057 = vmatprep.subr.mxu0 %v3423_v61  ;;  %3067 = vmatpush3.msra.mxu1 %v3605_v26 }
0x102d   :  { %3058 = vmatpush3.msra.mxu0 %v3508_v3  ;;  %3068 = vmatprep.subr.mxu1 %v3423_v61 }
0x102e   :  { %3059 = vmatprep.subr.mxu0 %v3423_v61  ;;  %3069 = vmatpush3.msra.mxu1 %v3615_v28 }
0x102f   :  { %3060 = vmatpush3.msra.mxu0 %v3503_v1  ;;  %3070 = vmatprep.subr.mxu1 %v3423_v61 }
0x1030   :  { %3062 = vmatmul.mubr.msk.f32.vlgmr.msra.gmra.mxu0 %vm97_vm0, %v3826_v59  ;;  %3071 = vmatpush3.msra.mxu1 %v3622_v30 }
0x1031   :  { %3072 = vmatprep.mubr.msk.f32.mxu1 %vm3424_vm5, %v3423_v61 }
0x10f0   :  { %v1576_v2 = vpop.f32.mrf.mxu0 }
0x10f1   :  { %v1577_v7 = vadd.f32 %v1576_v2, %v1505_v0 }
0x10f2   :  { %v3063_v8 = vpop.f32.mrf.mxu0 }
0x10f3   :  { %v1581_v9 = vsel %vm1580_vm7, %v1577_v7, -inf }
0x10f4   :  { %1582 = vmax.xlane.f32.xlu0 %v1581_v9 }
0x117d   :  { %v1583_v10 = vpop.xlane.xlu0 %1582 }
0x117e   :  { %vm1584_vm8 = vcmp.eq.f32.partialorder %v1577_v7, %v1583_v10 }
0x117f   :  { %v1585_v11 = vsel %vm1584_vm8, %v3548_v16, 128 }
0x1180   :  { %v1586_v13 = vsel %vm1580_vm7, %v1585_v11, 2147483647 }
0x1181   :  { %v1588_v14 = vshra.s32 %v1586_v13, 16  ;;  %v1587_v18 = vand.u32 65535, %v1586_v13 }
0x1183   :  { %v1590_v17 = vcvt.s32.f32 %v1588_v14  ;;  %v1589_v20 = vcvt.s32.f32 %v1587_v18 }
0x1185   :  { %1591 = vmin.xlane.f32.xlu0 %v1590_v17 }
0x120e   :  { %v1592_v19 = vpop.xlane.xlu0 %1591 }
0x120f   :  { %vm1593_vm9 = vcmp.eq.f32.partialorder %v1590_v17, %v1592_v19  ;;  %v1598_v29 = vcvt.f32.s32 %v1592_v19 }
0x1210   :  { %v1594_v21 = vsel %vm1593_vm9, %v1589_v20, inf }
0x1211   :  { %1595 = vmin.xlane.f32.xlu1 %v1594_v21  ;;  %v1599_v32 = vshll.u32 %v1598_v29, 16 }
0x129a   :  { %v1596_v31 = vpop.xlane.xlu1 %1595 }
0x129b   :  { %v1597_v33 = vcvt.f32.s32 %v1596_v31 }
0x129d   :  { %v1600_v34 = vadd.s32 %v1599_v32, %v1597_v33 }
0x129f   :  { %vm1601_vm10 = vcmp.eq.s32.totalorder %v3548_v16, %v1600_v34 }
0x12a0   :  { %v2690_v35 = vsel %vm1601_vm10, 1.0, %v3423_v61 }
0x12a1   :  { %3073 = vmatmul.mubr.msk.f32.vlgmr.msra.gmra.mxu1 %vm97_vm0, %v2690_v35 }
0x1361   :  { %v1673_v36 = vpop.f32.mrf.mxu1 }
0x1362   :  { %v1674_v60 = vadd.f32 %v3661_v43, %v1673_v36  }
0x1363   :  { %v3074_v37 = vpop.f32.mrf.mxu1 }
0x1364 PF:  { %3075 = vmatprep.subr.mxu0 %v3417_v12  ;;  %3083 = vmatprep.mubr.msk.f32.mxu0 %vm3418_vm3, %v3417_v12  ;;  %s3863_s0 = sld [smem:[#allocation5 + $0x4]]  ;;  %v1681_v39 = vld [vmem:[#allocation3 + $0x6] sm:$0x3]  ;;  %v3403_v46 = vmov 0   ;;  %v3401_v60 = vphi %v3399_v60, %v1674_v60  }
0x1365   :  { %3076 = vmatpush3.msra.mxu0 %v3717_v22  ;;  %s3207_s26 = scalar_select %p2688_p7, 1, 0 }
0x1366   :  { %3077 = vmatprep.subr.mxu0 %v3417_v12 }
0x1367   :  { %3078 = vmatpush3.msra.mxu0 %v3722_v23  ;;  %v3208_v38 = vstv %s3207_s26 }
0x1368   :  { %3079 = vmatprep.subr.mxu0 %v3417_v12  ;;  %vm3209_vm11 = vcmp.ne.s32.totalorder %v3208_v38, 0 }
0x1369   :  { %3080 = vmatpush3.msra.mxu0 %v3729_v24  ;;  %v3210_v40 = vsel %vm3209_vm11, %v1681_v39, %v3401_v60 }
0x136a   :  { %3081 = vmatprep.subr.mxu0 %v3417_v12  ;;  %p2694_p8 = scmp.ne.s32.totalorder %s3863_s0, 0 }
0x136b   :  { %3082 = vmatpush3.msra.mxu0 %v3736_v27 }
0x136c   :  { %3084 = vmatmul.mubr.msk.f32.vlgmr.msra.gmra.mxu0 %vm97_vm0, %v3826_v59 }
0x142c   :  { %v1752_v41 = vpop.f32.mrf.mxu0 }
0x142d   :  { %v1756_v42 = vadd.f32 %v3210_v40, %v1752_v41 }
0x142e   :  { %v3085_v44 = vpop.f32.mrf.mxu0 }
0x142f   :  { %3323 = vtanh.f32 %v1756_v42 }
0x1439   :  { %1763 = sbr.rel (%p2694_p8) target bundleno = 6011 (0x177b), region = 77 }
0x143c   :  { %v3867_v45 = vpop.eup %3323 }
0x143d   :  { %1758 = vst.msk [vmem:[#allocation4 + $0x6] sm:$0x3] %vm968_vm6, %v3867_v45 }
0x143e   :  { %v3425_v47 = vmov 0.0   ;;  %vm3426_vm12 = vmmov 0   ;;  %v1766_v48 = vshrl.u32 %v70_v15, 7  ;;  %vm1843_vm13 = vcmask 1041408  }
0x143f   :  { %3086 = vmatprep.subr.mxu0 %v3425_v47  ;;  %3094 = vmatprep.mubr.msk.f32.mxu0 %vm3426_vm12, %v3425_v47 }
0x1440   :  { %3087 = vmatpush3.msra.mxu0 %v3518_v5  ;;  %3097 = vmatprep.subr.mxu1 %v3425_v47  ;;  %v1767_v49 = vsub.s32 0, %v1766_v48 }
0x1441   :  { %3088 = vmatprep.subr.mxu0 %v3425_v47  ;;  %3098 = vmatpush3.msra.mxu1 %v3600_v25 }
0x1442   :  { %3089 = vmatpush3.msra.mxu0 %v3513_v4  ;;  %3099 = vmatprep.subr.mxu1 %v3425_v47  ;;  %v1768_v50 = vrot.slane %v3523_v6, %v1767_v49 }
0x1443   :  { %3090 = vmatprep.subr.mxu0 %v3425_v47  ;;  %3100 = vmatpush3.msra.mxu1 %v3605_v26 }
0x1444   :  { %3091 = vmatpush3.msra.mxu0 %v3508_v3  ;;  %3101 = vmatprep.subr.mxu1 %v3425_v47 }
0x1445   :  { %3092 = vmatprep.subr.mxu0 %v3425_v47  ;;  %3102 = vmatpush3.msra.mxu1 %v3615_v28 }
0x1446   :  { %3093 = vmatpush3.msra.mxu0 %v3503_v1  ;;  %3103 = vmatprep.subr.mxu1 %v3425_v47 }
0x1447   :  { %3095 = vmatmul.mubr.msk.f32.vlgmr.msra.gmra.mxu0 %vm97_vm0, %v3867_v45  ;;  %3104 = vmatpush3.msra.mxu1 %v3622_v30 }
0x1448   :  { %3105 = vmatprep.mubr.msk.f32.mxu1 %vm3426_vm12, %v3425_v47 }
0x1507   :  { %v1839_v51 = vpop.f32.mrf.mxu0 }
0x1508   :  { %v1840_v52 = vadd.f32 %v1839_v51, %v1768_v50 }
0x1509   :  { %v3096_v53 = vpop.f32.mrf.mxu0 }
0x150a   :  { %v1844_v54 = vsel %vm1843_vm13, %v1840_v52, -inf }
0x150b   :  { %1845 = vmax.xlane.f32.xlu0 %v1844_v54 }
0x1594   :  { %v1846_v55 = vpop.xlane.xlu0 %1845 }
0x1595   :  { %vm1847_vm14 = vcmp.eq.f32.partialorder %v1840_v52, %v1846_v55 }
0x1596   :  { %v1848_v56 = vsel %vm1847_vm14, %v3548_v16, 128 }
0x1597   :  { %v1849_v57 = vsel %vm1843_vm13, %v1848_v56, 2147483647 }
0x1598   :  { %v1851_v58 = vshra.s32 %v1849_v57, 16  ;;  %v1850_v60 = vand.u32 65535, %v1849_v57 }
0x159a   :  { %v1853_v59 = vcvt.s32.f32 %v1851_v58  ;;  %v1852_v62 = vcvt.s32.f32 %v1850_v60 }
0x159c   :  { %1854 = vmin.xlane.f32.xlu0 %v1853_v59 }
0x1625   :  { %v1855_v61 = vpop.xlane.xlu0 %1854 }
0x1626   :  { %vm1856_vm15 = vcmp.eq.f32.partialorder %v1853_v59, %v1855_v61  ;;  %v1861_v0 = vcvt.f32.s32 %v1855_v61 }
0x1627   :  { %v1857_v63 = vsel %vm1856_vm15, %v1852_v62, inf }
0x1628   :  { %1858 = vmin.xlane.f32.xlu1 %v1857_v63  ;;  %v1862_v7 = vshll.u32 %v1861_v0, 16 }
0x16b1   :  { %v1859_v2 = vpop.xlane.xlu1 %1858 }
0x16b2   :  { %v1860_v8 = vcvt.f32.s32 %v1859_v2 }
0x16b4   :  { %v1863_v9 = vadd.s32 %v1862_v7, %v1860_v8 }
0x16b6   :  { %vm1864_vm1 = vcmp.eq.s32.totalorder %v3548_v16, %v1863_v9 }
0x16b7   :  { %v2696_v10 = vsel %vm1864_vm1, 1.0, %v3425_v47 }
0x16b8   :  { %3106 = vmatmul.mubr.msk.f32.vlgmr.msra.gmra.mxu1 %vm97_vm0, %v2696_v10 }
0x1778   :  { %v1936_v11 = vpop.f32.mrf.mxu1 }
0x1779   :  { %v1937_v46 = vadd.f32 %v3661_v43, %v1936_v11  }
0x177a   :  { %v3107_v13 = vpop.f32.mrf.mxu1 }
0x177b PF:  { %3108 = vmatprep.subr.mxu0 %v3417_v12  ;;  %3116 = vmatprep.mubr.msk.f32.mxu0 %vm3418_vm3, %v3417_v12  ;;  %s3904_s27 = sld [smem:[#allocation5 + $0x5]]  ;;  %v1944_v17 = vld [vmem:[#allocation3 + $0x8] sm:$0x3]  ;;  %v3407_v31 = vmov 0   ;;  %v3405_v46 = vphi %v3403_v46, %v1937_v46  }
0x177c   :  { %3109 = vmatpush3.msra.mxu0 %v3717_v22  ;;  %s3212_s28 = scalar_select %p2694_p8, 1, 0 }
0x177d   :  { %3110 = vmatprep.subr.mxu0 %v3417_v12 }
0x177e   :  { %3111 = vmatpush3.msra.mxu0 %v3722_v23  ;;  %v3213_v14 = vstv %s3212_s28 }
0x177f   :  { %3112 = vmatprep.subr.mxu0 %v3417_v12  ;;  %vm3214_vm2 = vcmp.ne.s32.totalorder %v3213_v14, 0 }
0x1780   :  { %3113 = vmatpush3.msra.mxu0 %v3729_v24  ;;  %v3215_v18 = vsel %vm3214_vm2, %v1944_v17, %v3405_v46 }
0x1781   :  { %3114 = vmatprep.subr.mxu0 %v3417_v12  ;;  %p2700_p9 = scmp.ne.s32.totalorder %s3904_s27, 0 }
0x1782   :  { %3115 = vmatpush3.msra.mxu0 %v3736_v27 }
0x1783   :  { %3117 = vmatmul.mubr.msk.f32.vlgmr.msra.gmra.mxu0 %vm97_vm0, %v3867_v45 }
0x1843   :  { %v2015_v19 = vpop.f32.mrf.mxu0 }
0x1844   :  { %v2019_v20 = vadd.f32 %v3215_v18, %v2015_v19 }
0x1845   :  { %v3118_v21 = vpop.f32.mrf.mxu0 }
0x1846   :  { %3325 = vtanh.f32 %v2019_v20 }
0x1850   :  { %2026 = sbr.rel (%p2700_p9) target bundleno = 7058 (0x1b92), region = 85 }
0x1853   :  { %v3908_v29 = vpop.eup %3325 }
0x1854   :  { %2021 = vst.msk [vmem:[#allocation4 + $0x8] sm:$0x3] %vm968_vm6, %v3908_v29 }
0x1855   :  { %v3427_v32 = vmov 0.0   ;;  %vm3428_vm4 = vmmov 0   ;;  %v2029_v33 = vshrl.u32 %v70_v15, 7  ;;  %vm2106_vm5 = vcmask 1041408  }
0x1856   :  { %3119 = vmatprep.subr.mxu0 %v3427_v32  ;;  %3127 = vmatprep.mubr.msk.f32.mxu0 %vm3428_vm4, %v3427_v32 }
0x1857   :  { %3120 = vmatpush3.msra.mxu0 %v3518_v5  ;;  %3130 = vmatprep.subr.mxu1 %v3427_v32  ;;  %v2030_v34 = vsub.s32 0, %v2029_v33 }
0x1858   :  { %3121 = vmatprep.subr.mxu0 %v3427_v32  ;;  %3131 = vmatpush3.msra.mxu1 %v3600_v25 }
0x1859   :  { %3122 = vmatpush3.msra.mxu0 %v3513_v4  ;;  %3132 = vmatprep.subr.mxu1 %v3427_v32  ;;  %v2031_v35 = vrot.slane %v3523_v6, %v2030_v34 }
0x185a   :  { %3123 = vmatprep.subr.mxu0 %v3427_v32  ;;  %3133 = vmatpush3.msra.mxu1 %v3605_v26 }
0x185b   :  { %3124 = vmatpush3.msra.mxu0 %v3508_v3  ;;  %3134 = vmatprep.subr.mxu1 %v3427_v32 }
0x185c   :  { %3125 = vmatprep.subr.mxu0 %v3427_v32  ;;  %3135 = vmatpush3.msra.mxu1 %v3615_v28 }
0x185d   :  { %3126 = vmatpush3.msra.mxu0 %v3503_v1  ;;  %3136 = vmatprep.subr.mxu1 %v3427_v32 }
0x185e   :  { %3128 = vmatmul.mubr.msk.f32.vlgmr.msra.gmra.mxu0 %vm97_vm0, %v3908_v29  ;;  %3137 = vmatpush3.msra.mxu1 %v3622_v30 }
0x185f   :  { %3138 = vmatprep.mubr.msk.f32.mxu1 %vm3428_vm4, %v3427_v32 }
0x191e   :  { %v2102_v36 = vpop.f32.mrf.mxu0 }
0x191f   :  { %v2103_v37 = vadd.f32 %v2102_v36, %v2031_v35 }
0x1920   :  { %v3129_v38 = vpop.f32.mrf.mxu0 }
0x1921   :  { %v2107_v39 = vsel %vm2106_vm5, %v2103_v37, -inf }
0x1922   :  { %2108 = vmax.xlane.f32.xlu0 %v2107_v39 }
0x19ab   :  { %v2109_v40 = vpop.xlane.xlu0 %2108 }
0x19ac   :  { %vm2110_vm7 = vcmp.eq.f32.partialorder %v2103_v37, %v2109_v40 }
0x19ad   :  { %v2111_v41 = vsel %vm2110_vm7, %v3548_v16, 128 }
0x19ae   :  { %v2112_v42 = vsel %vm2106_vm5, %v2111_v41, 2147483647 }
0x19af   :  { %v2114_v44 = vshra.s32 %v2112_v42, 16  ;;  %v2113_v46 = vand.u32 65535, %v2112_v42 }
0x19b1   :  { %v2116_v45 = vcvt.s32.f32 %v2114_v44  ;;  %v2115_v48 = vcvt.s32.f32 %v2113_v46 }
0x19b3   :  { %2117 = vmin.xlane.f32.xlu0 %v2116_v45 }
0x1a3c   :  { %v2118_v47 = vpop.xlane.xlu0 %2117 }
0x1a3d   :  { %vm2119_vm8 = vcmp.eq.f32.partialorder %v2116_v45, %v2118_v47  ;;  %v2124_v50 = vcvt.f32.s32 %v2118_v47 }
0x1a3e   :  { %v2120_v49 = vsel %vm2119_vm8, %v2115_v48, inf }
0x1a3f   :  { %2121 = vmin.xlane.f32.xlu1 %v2120_v49  ;;  %v2125_v52 = vshll.u32 %v2124_v50, 16 }
0x1ac8   :  { %v2122_v51 = vpop.xlane.xlu1 %2121 }
0x1ac9   :  { %v2123_v53 = vcvt.f32.s32 %v2122_v51 }
0x1acb   :  { %v2126_v54 = vadd.s32 %v2125_v52, %v2123_v53 }
0x1acd   :  { %vm2127_vm9 = vcmp.eq.s32.totalorder %v3548_v16, %v2126_v54 }
0x1ace   :  { %v2702_v55 = vsel %vm2127_vm9, 1.0, %v3427_v32 }
0x1acf   :  { %3139 = vmatmul.mubr.msk.f32.vlgmr.msra.gmra.mxu1 %vm97_vm0, %v2702_v55 }
0x1b8f   :  { %v2199_v56 = vpop.f32.mrf.mxu1 }
0x1b90   :  { %v2200_v31 = vadd.f32 %v3661_v43, %v2199_v56  }
0x1b91   :  { %v3140_v57 = vpop.f32.mrf.mxu1 }
0x1b92 PF:  { %3141 = vmatprep.subr.mxu0 %v3417_v12  ;;  %3149 = vmatprep.mubr.msk.f32.mxu0 %vm3418_vm3, %v3417_v12  ;;  %s3945_s29 = sld [smem:[#allocation5 + $0x6]]  ;;  %v2207_v59 = vld [vmem:[#allocation3 + $0xa] sm:$0x3]  ;;  %v3411_v2 = vmov 0   ;;  %v3409_v31 = vphi %v3407_v31, %v2200_v31  }
0x1b93   :  { %3142 = vmatpush3.msra.mxu0 %v3717_v22  ;;  %s3217_s4 = scalar_select %p2700_p9, 1, 0 }
0x1b94   :  { %3143 = vmatprep.subr.mxu0 %v3417_v12 }
0x1b95   :  { %3144 = vmatpush3.msra.mxu0 %v3722_v23  ;;  %v3218_v58 = vstv %s3217_s4 }
0x1b96   :  { %3145 = vmatprep.subr.mxu0 %v3417_v12  ;;  %vm3219_vm10 = vcmp.ne.s32.totalorder %v3218_v58, 0 }
0x1b97   :  { %3146 = vmatpush3.msra.mxu0 %v3729_v24  ;;  %v3220_v60 = vsel %vm3219_vm10, %v2207_v59, %v3409_v31 }
0x1b98   :  { %3147 = vmatprep.subr.mxu0 %v3417_v12  ;;  %p2706_p10 = scmp.ne.s32.totalorder %s3945_s29, 0 }
0x1b99   :  { %3148 = vmatpush3.msra.mxu0 %v3736_v27 }
0x1b9a   :  { %3150 = vmatmul.mubr.msk.f32.vlgmr.msra.gmra.mxu0 %vm97_vm0, %v3908_v29 }
0x1c5a   :  { %v2278_v61 = vpop.f32.mrf.mxu0 }
0x1c5b   :  { %v2282_v62 = vadd.f32 %v3220_v60, %v2278_v61 }
0x1c5c   :  { %v3151_v63 = vpop.f32.mrf.mxu0 }
0x1c5d   :  { %3327 = vtanh.f32 %v2282_v62 }
0x1c67   :  { %2289 = sbr.rel (%p2706_p10) target bundleno = 8105 (0x1fa9), region = 93 }
0x1c6a   :  { %v3949_v0 = vpop.eup %3327 }
0x1c6b   :  { %2284 = vst.msk [vmem:[#allocation4 + $0xa] sm:$0x3] %vm968_vm6, %v3949_v0 }
0x1c6c   :  { %v3429_v7 = vmov 0.0   ;;  %vm3430_vm11 = vmmov 0   ;;  %vm2369_vm12 = vcmask 1041408  }
0x1c6d   :  { %3152 = vmatprep.subr.mxu0 %v3429_v7  ;;  %3160 = vmatprep.mubr.msk.f32.mxu0 %vm3430_vm11, %v3429_v7 }
0x1c6e   :  { %3153 = vmatpush3.msra.mxu0 %v3518_v5  ;;  %3163 = vmatprep.subr.mxu1 %v3429_v7 }
0x1c6f   :  { %3154 = vmatprep.subr.mxu0 %v3429_v7  ;;  %3164 = vmatpush3.msra.mxu1 %v3600_v25  ;;  %v2292_v25 = vshrl.u32 %v70_v15, 7 }
0x1c70   :  { %3155 = vmatpush3.msra.mxu0 %v3513_v4  ;;  %3165 = vmatprep.subr.mxu1 %v3429_v7 }
0x1c71   :  { %3156 = vmatprep.subr.mxu0 %v3429_v7  ;;  %3166 = vmatpush3.msra.mxu1 %v3605_v26  ;;  %v2293_v8 = vsub.s32 0, %v2292_v25 }
0x1c72   :  { %3157 = vmatpush3.msra.mxu0 %v3508_v3  ;;  %3167 = vmatprep.subr.mxu1 %v3429_v7 }
0x1c73   :  { %3158 = vmatprep.subr.mxu0 %v3429_v7  ;;  %3168 = vmatpush3.msra.mxu1 %v3615_v28  ;;  %v2294_v26 = vrot.slane %v3523_v6, %v2293_v8 }
0x1c74   :  { %3159 = vmatpush3.msra.mxu0 %v3503_v1  ;;  %3169 = vmatprep.subr.mxu1 %v3429_v7 }
0x1c75   :  { %3161 = vmatmul.mubr.msk.f32.vlgmr.msra.gmra.mxu0 %vm97_vm0, %v3949_v0  ;;  %3170 = vmatpush3.msra.mxu1 %v3622_v30 }
0x1c76   :  { %3171 = vmatprep.mubr.msk.f32.mxu1 %vm3430_vm11, %v3429_v7 }
0x1d35   :  { %v2365_v9 = vpop.f32.mrf.mxu0 }
0x1d36   :  { %v2366_v10 = vadd.f32 %v2365_v9, %v2294_v26 }
0x1d37   :  { %v3162_v11 = vpop.f32.mrf.mxu0 }
0x1d38   :  { %v2370_v28 = vsel %vm2369_vm12, %v2366_v10, -inf }
0x1d39   :  { %2371 = vmax.xlane.f32.xlu0 %v2370_v28 }
0x1dc2   :  { %v2372_v13 = vpop.xlane.xlu0 %2371 }
0x1dc3   :  { %vm2373_vm13 = vcmp.eq.f32.partialorder %v2366_v10, %v2372_v13 }
0x1dc4   :  { %v2374_v14 = vsel %vm2373_vm13, %v3548_v16, 128 }
0x1dc5   :  { %v2375_v17 = vsel %vm2369_vm12, %v2374_v14, 2147483647 }
0x1dc6   :  { %v2377_v18 = vshra.s32 %v2375_v17, 16  ;;  %v2376_v19 = vand.u32 65535, %v2375_v17 }
0x1dc8   :  { %v2379_v30 = vcvt.s32.f32 %v2377_v18  ;;  %v2378_v21 = vcvt.s32.f32 %v2376_v19 }
0x1dca   :  { %2380 = vmin.xlane.f32.xlu0 %v2379_v30 }
0x1e53   :  { %v2381_v20 = vpop.xlane.xlu0 %2380 }
0x1e54   :  { %vm2382_vm14 = vcmp.eq.f32.partialorder %v2379_v30, %v2381_v20  ;;  %v2387_v31 = vcvt.f32.s32 %v2381_v20 }
0x1e55   :  { %v2383_v29 = vsel %vm2382_vm14, %v2378_v21, inf }
0x1e56   :  { %2384 = vmin.xlane.f32.xlu1 %v2383_v29  ;;  %v2388_v33 = vshll.u32 %v2387_v31, 16 }
0x1edf   :  { %v2385_v32 = vpop.xlane.xlu1 %2384 }
0x1ee0   :  { %v2386_v34 = vcvt.f32.s32 %v2385_v32 }
0x1ee2   :  { %v2389_v35 = vadd.s32 %v2388_v33, %v2386_v34 }
0x1ee4   :  { %vm2390_vm15 = vcmp.eq.s32.totalorder %v3548_v16, %v2389_v35 }
0x1ee5   :  { %v2708_v36 = vsel %vm2390_vm15, 1.0, %v3429_v7 }
0x1ee6   :  { %3172 = vmatmul.mubr.msk.f32.vlgmr.msra.gmra.mxu1 %vm97_vm0, %v2708_v36 }
0x1fa6   :  { %v2462_v37 = vpop.f32.mrf.mxu1 }
0x1fa7   :  { %v2463_v2 = vadd.f32 %v3661_v43, %v2462_v37  }
0x1fa8   :  { %v3173_v38 = vpop.f32.mrf.mxu1 }
0x1fa9 PF:  { %3174 = vmatprep.subr.mxu0 %v3417_v12  ;;  %3182 = vmatprep.mubr.msk.f32.mxu0 %vm3418_vm3, %v3417_v12  ;;  %2548 = vst [vmem:[#allocation8] sm:$0x3] %v3417_v12  ;;  %s3222_s30 = scalar_select %p2706_p10, 1, 0  ;;  %v2470_v16 = vld [vmem:[#allocation3 + $0xc] sm:$0x3]  ;;  %v3413_v2 = vphi %v3411_v2, %v2463_v2  }
0x1faa   :  { %3175 = vmatpush3.msra.mxu0 %v3717_v22  ;;  %3185 = vmatprep.subr.mxu1 %v3518_v5  ;;  %s3431_s12 = smov [#allocation8]  }
0x1fab   :  { %3176 = vmatprep.subr.mxu0 %v3417_v12  ;;  %3186 = vmatpush3.msra.mxu1 %v3518_v5  ;;  %v2549_v5 = vld [vmem:[#allocation4] sm:$0xff]  ;;  %s2645_s13 = sshll.u32 %s3431_s12, 4  ;;  %s2646_s13 = int_to_ptr.vmem [resolvable:$true] %s2645_s13 }
0x1fac   :  { %3177 = vmatpush3.msra.mxu0 %v3722_v23  ;;  %3187 = vmatprep.subr.mxu1 %v3513_v4  ;;  %s3343_s14 = scalar_lea.vmem %s2646_s13, 256  ;;  %p3348_p12 = scmp.lt.s32.totalorder %s2646_s13, %s2646_s13 }
0x1fad   :  { %3178 = vmatprep.subr.mxu0 %v3417_v12  ;;  %3188 = vmatpush3.msra.mxu1 %v3513_v4  ;;  %v3223_v4 = vstv %s3222_s30  ;;  %p3344_p11 = scmp.ne.s32.totalorder %s2646_s13, %s3343_s14  ;;  %p3349_p13 = scmp.lt.s32.totalorder %s3343_s14, %s3343_s14 }
0x1fae   :  { %3179 = vmatpush3.msra.mxu0 %v3729_v24  ;;  %3189 = vmatprep.subr.mxu1 %v3508_v3  ;;  %vm3224_vm3 = vcmp.ne.s32.totalorder %v3223_v4, 0 }
0x1faf   :  { %3180 = vmatprep.subr.mxu0 %v3417_v12  ;;  %3190 = vmatpush3.msra.mxu1 %v3508_v3  ;;  %v3225_v12 = vsel %vm3224_vm3, %v2470_v16, %v3413_v2  ;;  %p3350_p0 = por %p3349_p13, %p3348_p12 }
0x1fb0   :  { %3181 = vmatpush3.msra.mxu0 %v3736_v27  ;;  %3191 = vmatprep.subr.mxu1 %v3503_v1 }
0x1fb1   :  { %3183 = vmatmul.mubr.msk.f32.vlgmr.msra.gmra.mxu0 %vm97_vm0, %v3949_v0  ;;  %3192 = vmatpush3.msra.mxu1 %v3503_v1  ;;  %v2553_v1 = vshrl.u32 %v70_v15, 7  ;;  %p3351_p1 = pnand %p3350_p0, %p3344_p11 }
0x1fb2   :  { %3193 = vmatprep.mubr.msk.f32.mxu1 %vm97_vm0, %v2549_v5 }
0x1fb3   :  { %v2554_v27 = vsub.s32 0, %v2553_v1 }
0x1fb5   :  { %v2555_v39 = vrot.slane %v3523_v6, %v2554_v27 }
0x2071   :  { %v2541_v43 = vpop.f32.mrf.mxu0 }
0x2072   :  { %v2545_v3 = vadd.f32 %v3225_v12, %v2541_v43 }
0x2073   :  { %v3184_v22 = vpop.f32.mrf.mxu0 }
0x2074   :  { %3329 = vtanh.f32 %v2545_v3 }
0x2081   :  { %v3330_v23 = vpop.eup %3329 }
0x2082   :  { %2547 = vst.msk [vmem:[#allocation4 + $0xc] sm:$0x3] %vm968_vm6, %v3330_v23 }
0x2089   :  { %v2550_v24 = vld [vmem:[#allocation4 + $0x8] sm:$0x3f] }
0x208a   :  { %3194 = vmatmul.mubr.msk.f32.vlgmr.msra.gmra.mxu1 %vm97_vm0, %v2550_v24 }
0x214a   :  { %v3195_v40 = vpop.f32.mrf.mxu1 }
0x214b   :  { %v2635_v41 = vadd.f32 %v3195_v40, %v2555_v39 }
0x214c   :  { %v2629_v42 = vpop.f32.mrf.mxu1 }
0x214d   :  { %2639 = vst [vmem:[#allocation8 + $0xa] sm:$0x3f] %v2635_v41  ;;  %v2630_v44 = vadd.f32 %v2629_v42, %v2555_v39 }
0x214f   :  { %2638 = vst [vmem:[#allocation8 + $0x2] sm:$0xff] %v2630_v44 }
0x2150   :  { %3354 = shalt.err (!%p3351_p1)
}
0x2151   :  { %s3432_s15 = smov 128   ;;  %s3433_s16 = smov 8  }
0x2152   :  { %2651 = dma.vmem_to_hbm [thread:$0]  %s2646_s13, 256, %s4016_s11, [#allocation6], %s3432_s15, %s3432_s15, %s3433_s16  }
0x2153   :  { %3389 = dma.done.wait [#allocation6], 256  }
0x2154   :  { %3390 = vsyncadd [#allocation6], 4294967040 }
0x2155   :  { %2655 = vsyncpa [#allocation6], 1 }
0x2156   :  { %2656 = vsyncpa [#allocation7], 1 }

</bundles_post_ra>
